<compile_context>
chip_gen: v5e
topology: v5e:2x2
jax: 0.10.0
libtpu: 0.0.40
codegen_flags: <defaults>
</compile_context>

<pallas_src>
import jax
import jax.numpy as jnp
import numpy as np
from jax.experimental import pallas as pl
from jax.experimental.pallas import tpu as pltpu


def _make_double_conv_kernel(TH, W, HPAD, MPAD, NS, HB):
    THW = TH * W
    L_MID = (TH + 2) * W

    def kernel(xc_ref, xp_ref, xn_ref, w1_ref, b1_ref, w2_ref, b2_ref,
               o_ref, xs_ref, mid_ref):
        # xc_ref : (1, Cin, THW)            current input strip (flat rows)
        # xp_ref : (1, Cin, HB)             block holding the 2 rows above
        # xn_ref : (1, Cin, HB)             block holding the 2 rows below
        # w1_ref : (9, Cmid, Cin)           tap-major conv1 weights (k=kh*3+kw)
        # b1_ref : (Cmid, 1)                conv1 bias
        # w2_ref : (9, Cout, Cmid)          conv2 weights
        # b2_ref : (Cout, 1)                conv2 bias
        # o_ref  : (1, Cout, THW)           lane-dense output strip
        # xs_ref : (Cin, HPAD + (TH+4)*W + 1)   staged input slab (w/ halos)
        # mid_ref: (Cmid, MPAD + (TH+2)*W + 1)  conv1 output slab (w/ halos)
        s = pl.program_id(1)
        cin = xs_ref.shape[0]
        cmid = mid_ref.shape[0]

        # Per-column validity masks for the +/-1-lane taps (hoisted).
        def col_masks(L):
            col = jax.lax.broadcasted_iota(jnp.int32, (1, L), 1) % W
            return col >= 1, col <= W - 2

        l_ok_m, r_ok_m = col_masks(L_MID)   # conv1 output (TH+2 rows)
        l_ok_o, r_ok_o = col_masks(THW)     # conv2 output (TH rows)

        # ---- stage the input strip + 2 halo rows per side into xs_ref ----
        if NS == 1:
            top = jnp.zeros((cin, 2 * W), jnp.float32)
            bot = jnp.zeros((cin, 2 * W), jnp.float32)
        else:
            top = jnp.where(s > 0, xp_ref[0, :, HB - 2 * W:], 0.0)
            bot = jnp.where(s < NS - 1, xn_ref[0, :, :2 * W], 0.0)
        xs_ref[:, HPAD:HPAD + 2 * W] = top
        xs_ref[:, HPAD + 2 * W:HPAD + 2 * W + THW] = xc_ref[0]  # 128-aligned
        xs_ref[:, HPAD + 2 * W + THW:HPAD + 4 * W + THW] = bot

        def conv3x3_relu(src_ref, base, L, w_ref, b_ref, l_ok, r_ok):
            c_out = w_ref.shape[1]
            # Accumulator starts at the broadcast bias (no zeros + add pass).
            acc = jnp.broadcast_to(b_ref[...], (c_out, L)).astype(jnp.float32)
            for oy in (-1, 0, 1):
                row0 = base + (1 + oy) * W
                for ox in (-1, 0, 1):
                    # Slice the ref directly (no whole-slab materialisation).
                    v = src_ref[:, row0 + ox:row0 + ox + L]
                    if ox == -1:
                        v = jnp.where(l_ok, v, 0.0)
                    elif ox == 1:
                        v = jnp.where(r_ok, v, 0.0)
                    k = (oy + 1) * 3 + (ox + 1)
                    acc = acc + jnp.dot(w_ref[k], v,
                                        preferred_element_type=jnp.float32)
            return jnp.maximum(acc, 0.0)

        # ---- conv1 (3x3, pad=1) + bias + ReLU -> TH+2 rows into mid slab ----
        mid_ref[:, MPAD:MPAD + L_MID] = conv3x3_relu(
            xs_ref, HPAD, L_MID, w1_ref, b1_ref, l_ok_m, r_ok_m)

        # conv2's zero padding: the first/last slab rows must be exact zeros
        # on image-boundary strips (written only there, never re-zeroed).
        @pl.when(s == 0)
        def _():
            mid_ref[:, MPAD:MPAD + W] = jnp.zeros((cmid, W), jnp.float32)

        @pl.when(s == NS - 1)
        def _():
            mid_ref[:, MPAD + (TH + 1) * W:MPAD + L_MID] = jnp.zeros(
                (cmid, W), jnp.float32)

        # ---- conv2 (3x3, pad=1) + bias + ReLU -> output strip ----
        o_ref[0] = conv3x3_relu(
            mid_ref, MPAD, THW, w2_ref, b2_ref, l_ok_o, r_ok_o
        ).astype(o_ref.dtype)

    return kernel


def _choose_strip_rows(H, W, cin, cmid, cout, vmem_budget=24 * 1024 * 1024):
    """Largest row-strip TH that divides H, keeps TH*W a multiple of 128
    (lane-dense blocks / stores) and keeps per-step residency under budget."""
    bytes_per_lane = 4 * (7 * cin + 3 * cmid + 3 * cout)  # rough per-step bytes
    max_lanes = max(512, vmem_budget // bytes_per_lane)
    if H * W <= max_lanes:
        return H
    best = None
    for th in range(2, H):
        if H % th == 0 and (th * W) % 128 == 0 and th * W <= max_lanes:
            best = th
    return best if best is not None else H


def _halo_block_lanes(THW, W, HW, ns):
    """Smallest 128-multiple flat-axis block that covers a 2-row halo."""
    if ns == 1:
        return 128 if HW % 128 == 0 else HW   # unused in-kernel when ns == 1
    h = 128
    while not (h >= 2 * W and THW % h == 0):
        h += 128
    return h


def double_conv(x_nchw, w1, b1, w2, b2, *, strip_rows=None):
    """DoubleConv forward: (Conv3x3(pad=1)+bias -> ReLU) x 2.

    x_nchw: (N, Cin, H, W); w1: (Cmid, Cin, 3, 3); w2: (Cout, Cmid, 3, 3)
    in PyTorch OIHW layout; biases (Cmid,), (Cout,).
    """
    N, Cin, H, W = x_nchw.shape
    Cmid = w1.shape[0]
    Cout = w2.shape[0]
    HW = H * W

    if strip_rows is None:
        TH = _choose_strip_rows(H, W, Cin, Cmid, Cout)
    else:
        TH = int(strip_rows)
    if TH != H and (TH < 2 or H % TH != 0 or (TH * W) % 128 != 0):
        raise ValueError("strip_rows must divide H, be >= 2, and give a "
                         "128-lane-multiple strip (or equal H)")
    NS = H // TH
    THW = TH * W
    HB = _halo_block_lanes(THW, W, HW, NS)
    R = THW // HB
    NBH = HW // HB

    # Lane-aligned staging offsets: the current-strip store starts at a
    # multiple of 128 and there is >= 1 margin lane for the ox = -1 tap.
    HPAD = (-2 * W) % 128
    if HPAD == 0:
        HPAD = 128
    MPAD = 128
    XW = HPAD + (TH + 4) * W + 1
    MW = MPAD + (TH + 2) * W + 1

    # NCHW -> (N, Cin, H*W) is a free contiguous reshape; no host-side pad.
    x_flat = x_nchw.reshape(N, Cin, HW)

    # OIHW -> (k, O, I) with k = kh*3 + kw, matching the in-kernel tap order.
    w1_r = jnp.transpose(w1, (2, 3, 0, 1)).reshape(9, Cmid, Cin)
    w2_r = jnp.transpose(w2, (2, 3, 0, 1)).reshape(9, Cout, Cmid)
    b1_r = b1.reshape(Cmid, 1)
    b2_r = b2.reshape(Cout, 1)

    kernel = _make_double_conv_kernel(TH, W, HPAD, MPAD, NS, HB)

    flops = 2 * N * HW * 9 * (Cin * Cmid + Cmid * Cout)
    bytes_accessed = 4 * (x_flat.size + w1_r.size + w2_r.size
                          + b1_r.size + b2_r.size + N * Cout * HW)

    # Explicit scoped-VMEM limit: double-buffered blocks + scratch + headroom,
    # kept well under every chip's physical VMEM (64 MiB on v7x).
    block_bytes = 4 * (2 * Cin * (THW + 2 * HB) + 2 * Cout * THW
                       + 2 * (w1_r.size + w2_r.size + b1_r.size + b2_r.size)
                       + Cin * XW + Cmid * MW)
    vmem_limit = int(min(48 * 1024 * 1024,
                         max(32 * 1024 * 1024, 3 * block_bytes)))

    out_flat = pl.pallas_call(
        kernel,
        out_shape=jax.ShapeDtypeStruct((N, Cout, HW), x_nchw.dtype),
        grid_spec=pltpu.PrefetchScalarGridSpec(
            num_scalar_prefetch=0,
            grid=(N, NS),
            in_specs=[
                # Current strip (flat rows, lane-dense).
                pl.BlockSpec((1, Cin, THW), lambda b, s: (b, 0, s)),
                # Small neighbour blocks holding the 2 halo rows above/below
                # (clamped at the image boundary; masked to zero in-kernel).
                pl.BlockSpec((1, Cin, HB),
                             lambda b, s: (b, 0, jnp.maximum(s * R - 1, 0))),
                pl.BlockSpec((1, Cin, HB),
                             lambda b, s: (b, 0, jnp.minimum((s + 1) * R,
                                                             NBH - 1))),
                pl.BlockSpec((9, Cmid, Cin), lambda b, s: (0, 0, 0)),
                pl.BlockSpec((Cmid, 1), lambda b, s: (0, 0)),
                pl.BlockSpec((9, Cout, Cmid), lambda b, s: (0, 0, 0)),
                pl.BlockSpec((Cout, 1), lambda b, s: (0, 0)),
            ],
            out_specs=pl.BlockSpec((1, Cout, THW), lambda b, s: (b, 0, s)),
            scratch_shapes=[pltpu.VMEM((Cin, XW), jnp.float32),
                            pltpu.VMEM((Cmid, MW), jnp.float32)],
        ),
        compiler_params=pltpu.CompilerParams(
            dimension_semantics=("parallel", "parallel"),
            vmem_limit_bytes=vmem_limit),
        cost_estimate=pl.CostEstimate(
            flops=flops, transcendentals=0, bytes_accessed=bytes_accessed),
    )(x_flat, x_flat, x_flat, w1_r, b1_r, w2_r, b2_r)

    # Free reshape back to the PyTorch NCHW output convention.
    return out_flat.reshape(N, Cout, H, W)


def _reference(x, w1, b1, w2, b2):
    def conv_relu(x, w, b):
        y = jax.lax.conv_general_dilated(
            x, w, window_strides=(1, 1), padding=((1, 1), (1, 1)),
            dimension_numbers=("NCHW", "OIHW", "NCHW"))
        return jnp.maximum(y + b.reshape(1, -1, 1, 1), 0.0)

    return conv_relu(conv_relu(x, w1, b1), w2, b2)


def _run_case(key, N, Cin, Cout, H, W, strip_rows=None):
    kx, kw1, kb1, kw2, kb2 = jax.random.split(key, 5)
    x = jax.random.normal(kx, (N, Cin, H, W), dtype=jnp.float32)
    # PyTorch OIHW conv weights / biases, deterministic init.
    w1 = jax.random.normal(kw1, (Cout, Cin, 3, 3), dtype=jnp.float32) * 0.2
    b1 = 0.1 * jax.random.normal(kb1, (Cout,), dtype=jnp.float32)
    w2 = jax.random.normal(kw2, (Cout, Cout, 3, 3), dtype=jnp.float32) * 0.2
    b2 = 0.1 * jax.random.normal(kb2, (Cout,), dtype=jnp.float32)

    out = jax.block_until_ready(
        double_conv(x, w1, b1, w2, b2, strip_rows=strip_rows))
    ref = jax.block_until_ready(_reference(x, w1, b1, w2, b2))
    np.testing.assert_allclose(np.asarray(out), np.asarray(ref),
                               rtol=1e-4, atol=1e-4)


if __name__ == "__main__":
    k1, k2 = jax.random.split(jax.random.PRNGKey(0))
    # DoubleConv(4 -> 8) on a small 16x16 image (single-strip path).
    _run_case(k1, N=2, Cin=4, Cout=8, H=16, W=16)
    # Same module on a taller image, forced onto the multi-strip path
    # (4 row-strips of 8 rows each -> exercises the cross-strip halo logic).
    _run_case(k2, N=1, Cin=4, Cout=8, H=32, W=16, strip_rows=8)
    print("KERNEL_OK")
</pallas_src>

<mosaic_0001>
module attributes {stable_mosaic.version = 11 : i64} {
  func.func @kernel(%arg0: i32, %arg1: i32, %arg2: memref<1x4x256xf32, #tpu.memory_space<vmem>>, %arg3: memref<1x4x128xf32, #tpu.memory_space<vmem>>, %arg4: memref<1x4x128xf32, #tpu.memory_space<vmem>>, %arg5: memref<9x8x4xf32, #tpu.memory_space<vmem>>, %arg6: memref<8x1xf32, #tpu.memory_space<vmem>>, %arg7: memref<9x8x8xf32, #tpu.memory_space<vmem>>, %arg8: memref<8x1xf32, #tpu.memory_space<vmem>>, %arg9: memref<1x8x256xf32, #tpu.memory_space<vmem>>, %arg10: memref<4x417xf32, #tpu.memory_space<vmem>>, %arg11: memref<8x417xf32, #tpu.memory_space<vmem>>) attributes {dimension_semantics = [#tpu.dimension_semantics<parallel>, #tpu.dimension_semantics<parallel>], iteration_bounds = array<i64: 2, 1>, scalar_prefetch = 0 : i64, scratch_operands = 2 : i64, tpu.core_type = #tpu.core_type<tc>, window_params = [{transform_indices = @transform_0, window_bounds = array<i64: 1, 4, 256>}, {transform_indices = @transform_1, window_bounds = array<i64: 1, 4, 128>}, {transform_indices = @transform_2, window_bounds = array<i64: 1, 4, 128>}, {pipeline_mode = #tpu.pipeline_mode<synchronous>, transform_indices = @transform_3, window_bounds = array<i64: 9, 8, 4>}, {pipeline_mode = #tpu.pipeline_mode<synchronous>, transform_indices = @transform_4, window_bounds = array<i64: 8, 1>}, {pipeline_mode = #tpu.pipeline_mode<synchronous>, transform_indices = @transform_5, window_bounds = array<i64: 9, 8, 8>}, {pipeline_mode = #tpu.pipeline_mode<synchronous>, transform_indices = @transform_6, window_bounds = array<i64: 8, 1>}, {transform_indices = @transform_7, window_bounds = array<i64: 1, 8, 256>}]} {
    %0 = tpu.iota {dimensions = array<i32: 1>} : vector<1x288xi32>
    %c16_i32 = arith.constant 16 : i32
    %c0_i32 = arith.constant 0 : i32
    %1 = arith.cmpi eq, %c16_i32, %c0_i32 : i32
    %c1_i32 = arith.constant 1 : i32
    %2 = arith.select %1, %c1_i32, %c16_i32 : i32
    %3 = vector.broadcast %2 : i32 to vector<1x288xi32>
    %4 = arith.remsi %0, %3 : vector<1x288xi32>
    %c0_i32_0 = arith.constant 0 : i32
    %5 = vector.broadcast %c0_i32_0 : i32 to vector<1x288xi32>
    %6 = arith.cmpi ne, %4, %5 : vector<1x288xi32>
    %c0_i32_1 = arith.constant 0 : i32
    %7 = vector.broadcast %c0_i32_1 : i32 to vector<1x288xi32>
    %8 = arith.cmpi slt, %4, %7 : vector<1x288xi32>
    %c0_i32_2 = arith.constant 0 : i32
    %9 = arith.cmpi slt, %2, %c0_i32_2 : i32
    %10 = vector.broadcast %9 : i1 to vector<1x288xi1>
    %11 = vector.broadcast %10 : vector<1x288xi1> to vector<1x288xi1>
    %12 = arith.xori %8, %11 : vector<1x288xi1>
    %13 = arith.andi %12, %6 : vector<1x288xi1>
    %14 = vector.broadcast %2 : i32 to vector<1x288xi32>
    %15 = arith.addi %4, %14 : vector<1x288xi32>
    %16 = arith.select %13, %15, %4 : vector<1x288xi1>, vector<1x288xi32>
    %c1_i32_3 = arith.constant 1 : i32
    %17 = vector.broadcast %c1_i32_3 : i32 to vector<1x288xi32>
    %18 = arith.cmpi sge, %16, %17 : vector<1x288xi32>
    %c14_i32 = arith.constant 14 : i32
    %19 = vector.broadcast %c14_i32 : i32 to vector<1x288xi32>
    %20 = arith.cmpi sle, %16, %19 : vector<1x288xi32>
    %21 = tpu.iota {dimensions = array<i32: 1>} : vector<1x256xi32>
    %c16_i32_4 = arith.constant 16 : i32
    %c0_i32_5 = arith.constant 0 : i32
    %22 = arith.cmpi eq, %c16_i32_4, %c0_i32_5 : i32
    %c1_i32_6 = arith.constant 1 : i32
    %23 = arith.select %22, %c1_i32_6, %c16_i32_4 : i32
    %24 = vector.broadcast %23 : i32 to vector<1x256xi32>
    %25 = arith.remsi %21, %24 : vector<1x256xi32>
    %c0_i32_7 = arith.constant 0 : i32
    %26 = vector.broadcast %c0_i32_7 : i32 to vector<1x256xi32>
    %27 = arith.cmpi ne, %25, %26 : vector<1x256xi32>
    %c0_i32_8 = arith.constant 0 : i32
    %28 = vector.broadcast %c0_i32_8 : i32 to vector<1x256xi32>
    %29 = arith.cmpi slt, %25, %28 : vector<1x256xi32>
    %c0_i32_9 = arith.constant 0 : i32
    %30 = arith.cmpi slt, %23, %c0_i32_9 : i32
    %31 = vector.broadcast %30 : i1 to vector<1x256xi1>
    %32 = vector.broadcast %31 : vector<1x256xi1> to vector<1x256xi1>
    %33 = arith.xori %29, %32 : vector<1x256xi1>
    %34 = arith.andi %33, %27 : vector<1x256xi1>
    %35 = vector.broadcast %23 : i32 to vector<1x256xi32>
    %36 = arith.addi %25, %35 : vector<1x256xi32>
    %37 = arith.select %34, %36, %25 : vector<1x256xi1>, vector<1x256xi32>
    %c1_i32_10 = arith.constant 1 : i32
    %38 = vector.broadcast %c1_i32_10 : i32 to vector<1x256xi32>
    %39 = arith.cmpi sge, %37, %38 : vector<1x256xi32>
    %c14_i32_11 = arith.constant 14 : i32
    %40 = vector.broadcast %c14_i32_11 : i32 to vector<1x256xi32>
    %41 = arith.cmpi sle, %37, %40 : vector<1x256xi32>
    %cst = arith.constant 0.000000e+00 : f32
    %42 = vector.broadcast %cst : f32 to vector<4x32xf32>
    %cst_12 = arith.constant 0.000000e+00 : f32
    %43 = vector.broadcast %cst_12 : f32 to vector<4x32xf32>
    %c0 = arith.constant 0 : index
    %c96 = arith.constant 96 : index
    %44 = vector.load %arg10[%c0, %c96] : memref<4x417xf32, #tpu.memory_space<vmem>>, vector<4x32xf32>
    tpu.vector_store %arg10[%c0, %c96], %42 {strides = array<i32>} : memref<4x417xf32, #tpu.memory_space<vmem>>, vector<4x32xf32>,
    %c0_13 = arith.constant 0 : index
    %c0_14 = arith.constant 0 : index
    %c0_15 = arith.constant 0 : index
    %45 = vector.load %arg2[%c0_13, %c0_14, %c0_15] : memref<1x4x256xf32, #tpu.memory_space<vmem>>, vector<1x4x256xf32>
    %46 = vector.shape_cast %45 : vector<1x4x256xf32> to vector<4x256xf32>
    %c0_16 = arith.constant 0 : index
    %c128 = arith.constant 128 : index
    %47 = vector.load %arg10[%c0_16, %c128] : memref<4x417xf32, #tpu.memory_space<vmem>>, vector<4x256xf32>
    tpu.vector_store %arg10[%c0_16, %c128], %46 {strides = array<i32>} : memref<4x417xf32, #tpu.memory_space<vmem>>, vector<4x256xf32>,
    %c0_17 = arith.constant 0 : index
    %c384 = arith.constant 384 : index
    %48 = vector.load %arg10[%c0_17, %c384] : memref<4x417xf32, #tpu.memory_space<vmem>>, vector<4x32xf32>
    tpu.vector_store %arg10[%c0_17, %c384], %43 {strides = array<i32>} : memref<4x417xf32, #tpu.memory_space<vmem>>, vector<4x32xf32>,
    %c0_18 = arith.constant 0 : index
    %c0_19 = arith.constant 0 : index
    %49 = vector.load %arg6[%c0_18, %c0_19] : memref<8x1xf32, #tpu.memory_space<vmem>>, vector<8x1xf32>
    %50 = vector.shape_cast %49 : vector<8x1xf32> to vector<8x1xf32>
    %51 = vector.broadcast %50 : vector<8x1xf32> to vector<8x288xf32>
    %c0_20 = arith.constant 0 : index
    %c95 = arith.constant 95 : index
    %52 = vector.load %arg10[%c0_20, %c95] : memref<4x417xf32, #tpu.memory_space<vmem>>, vector<4x288xf32>
    %cst_21 = arith.constant 0.000000e+00 : f32
    %53 = vector.shape_cast %18 : vector<1x288xi1> to vector<1x288xi1>
    %54 = vector.broadcast %53 : vector<1x288xi1> to vector<4x288xi1>
    %55 = vector.broadcast %cst_21 : f32 to vector<4x288xf32>
    %56 = arith.select %54, %52, %55 : vector<4x288xi1>, vector<4x288xf32>
    %c0_22 = arith.constant 0 : index
    %c0_23 = arith.constant 0 : index
    %c0_24 = arith.constant 0 : index
    %57 = vector.load %arg5[%c0_22, %c0_23, %c0_24] : memref<9x8x4xf32, #tpu.memory_space<vmem>>, vector<1x8x4xf32>
    %58 = vector.shape_cast %57 : vector<1x8x4xf32> to vector<8x4xf32>
    %cst_25 = arith.constant dense<0.000000e+00> : vector<8x288xf32>
    %59 = tpu.matmul %58, %56, %cst_25 {dimension_numbers = #tpu.dot_dimension_numbers<[1], [0], [0], [1], [0, 0, 1, 1], [], []>} : vector<8x4xf32>, vector<4x288xf32>, vector<8x288xf32> -> vector<8x288xf32>
    %60 = arith.addf %51, %59 : vector<8x288xf32>
    %c0_26 = arith.constant 0 : index
    %c96_27 = arith.constant 96 : index
    %61 = vector.load %arg10[%c0_26, %c96_27] : memref<4x417xf32, #tpu.memory_space<vmem>>, vector<4x288xf32>
    %c1 = arith.constant 1 : index
    %c0_28 = arith.constant 0 : index
    %c0_29 = arith.constant 0 : index
    %62 = vector.load %arg5[%c1, %c0_28, %c0_29] : memref<9x8x4xf32, #tpu.memory_space<vmem>>, vector<1x8x4xf32>
    %63 = vector.shape_cast %62 : vector<1x8x4xf32> to vector<8x4xf32>
    %cst_30 = arith.constant dense<0.000000e+00> : vector<8x288xf32>
    %64 = tpu.matmul %63, %61, %cst_30 {dimension_numbers = #tpu.dot_dimension_numbers<[1], [0], [0], [1], [0, 0, 1, 1], [], []>} : vector<8x4xf32>, vector<4x288xf32>, vector<8x288xf32> -> vector<8x288xf32>
    %65 = arith.addf %60, %64 : vector<8x288xf32>
    %c0_31 = arith.constant 0 : index
    %c97 = arith.constant 97 : index
    %66 = vector.load %arg10[%c0_31, %c97] : memref<4x417xf32, #tpu.memory_space<vmem>>, vector<4x288xf32>
    %cst_32 = arith.constant 0.000000e+00 : f32
    %67 = vector.shape_cast %20 : vector<1x288xi1> to vector<1x288xi1>
    %68 = vector.broadcast %67 : vector<1x288xi1> to vector<4x288xi1>
    %69 = vector.broadcast %cst_32 : f32 to vector<4x288xf32>
    %70 = arith.select %68, %66, %69 : vector<4x288xi1>, vector<4x288xf32>
    %c2 = arith.constant 2 : index
    %c0_33 = arith.constant 0 : index
    %c0_34 = arith.constant 0 : index
    %71 = vector.load %arg5[%c2, %c0_33, %c0_34] : memref<9x8x4xf32, #tpu.memory_space<vmem>>, vector<1x8x4xf32>
    %72 = vector.shape_cast %71 : vector<1x8x4xf32> to vector<8x4xf32>
    %cst_35 = arith.constant dense<0.000000e+00> : vector<8x288xf32>
    %73 = tpu.matmul %72, %70, %cst_35 {dimension_numbers = #tpu.dot_dimension_numbers<[1], [0], [0], [1], [0, 0, 1, 1], [], []>} : vector<8x4xf32>, vector<4x288xf32>, vector<8x288xf32> -> vector<8x288xf32>
    %74 = arith.addf %65, %73 : vector<8x288xf32>
    %c0_36 = arith.constant 0 : index
    %c111 = arith.constant 111 : index
    %75 = vector.load %arg10[%c0_36, %c111] : memref<4x417xf32, #tpu.memory_space<vmem>>, vector<4x288xf32>
    %cst_37 = arith.constant 0.000000e+00 : f32
    %76 = vector.shape_cast %18 : vector<1x288xi1> to vector<1x288xi1>
    %77 = vector.broadcast %76 : vector<1x288xi1> to vector<4x288xi1>
    %78 = vector.broadcast %cst_37 : f32 to vector<4x288xf32>
    %79 = arith.select %77, %75, %78 : vector<4x288xi1>, vector<4x288xf32>
    %c3 = arith.constant 3 : index
    %c0_38 = arith.constant 0 : index
    %c0_39 = arith.constant 0 : index
    %80 = vector.load %arg5[%c3, %c0_38, %c0_39] : memref<9x8x4xf32, #tpu.memory_space<vmem>>, vector<1x8x4xf32>
    %81 = vector.shape_cast %80 : vector<1x8x4xf32> to vector<8x4xf32>
    %cst_40 = arith.constant dense<0.000000e+00> : vector<8x288xf32>
    %82 = tpu.matmul %81, %79, %cst_40 {dimension_numbers = #tpu.dot_dimension_numbers<[1], [0], [0], [1], [0, 0, 1, 1], [], []>} : vector<8x4xf32>, vector<4x288xf32>, vector<8x288xf32> -> vector<8x288xf32>
    %83 = arith.addf %74, %82 : vector<8x288xf32>
    %c0_41 = arith.constant 0 : index
    %c112 = arith.constant 112 : index
    %84 = vector.load %arg10[%c0_41, %c112] : memref<4x417xf32, #tpu.memory_space<vmem>>, vector<4x288xf32>
    %c4 = arith.constant 4 : index
    %c0_42 = arith.constant 0 : index
    %c0_43 = arith.constant 0 : index
    %85 = vector.load %arg5[%c4, %c0_42, %c0_43] : memref<9x8x4xf32, #tpu.memory_space<vmem>>, vector<1x8x4xf32>
    %86 = vector.shape_cast %85 : vector<1x8x4xf32> to vector<8x4xf32>
    %cst_44 = arith.constant dense<0.000000e+00> : vector<8x288xf32>
    %87 = tpu.matmul %86, %84, %cst_44 {dimension_numbers = #tpu.dot_dimension_numbers<[1], [0], [0], [1], [0, 0, 1, 1], [], []>} : vector<8x4xf32>, vector<4x288xf32>, vector<8x288xf32> -> vector<8x288xf32>
    %88 = arith.addf %83, %87 : vector<8x288xf32>
    %c0_45 = arith.constant 0 : index
    %c113 = arith.constant 113 : index
    %89 = vector.load %arg10[%c0_45, %c113] : memref<4x417xf32, #tpu.memory_space<vmem>>, vector<4x288xf32>
    %cst_46 = arith.constant 0.000000e+00 : f32
    %90 = vector.shape_cast %20 : vector<1x288xi1> to vector<1x288xi1>
    %91 = vector.broadcast %90 : vector<1x288xi1> to vector<4x288xi1>
    %92 = vector.broadcast %cst_46 : f32 to vector<4x288xf32>
    %93 = arith.select %91, %89, %92 : vector<4x288xi1>, vector<4x288xf32>
    %c5 = arith.constant 5 : index
    %c0_47 = arith.constant 0 : index
    %c0_48 = arith.constant 0 : index
    %94 = vector.load %arg5[%c5, %c0_47, %c0_48] : memref<9x8x4xf32, #tpu.memory_space<vmem>>, vector<1x8x4xf32>
    %95 = vector.shape_cast %94 : vector<1x8x4xf32> to vector<8x4xf32>
    %cst_49 = arith.constant dense<0.000000e+00> : vector<8x288xf32>
    %96 = tpu.matmul %95, %93, %cst_49 {dimension_numbers = #tpu.dot_dimension_numbers<[1], [0], [0], [1], [0, 0, 1, 1], [], []>} : vector<8x4xf32>, vector<4x288xf32>, vector<8x288xf32> -> vector<8x288xf32>
    %97 = arith.addf %88, %96 : vector<8x288xf32>
    %c0_50 = arith.constant 0 : index
    %c127 = arith.constant 127 : index
    %98 = vector.load %arg10[%c0_50, %c127] : memref<4x417xf32, #tpu.memory_space<vmem>>, vector<4x288xf32>
    %cst_51 = arith.constant 0.000000e+00 : f32
    %99 = vector.shape_cast %18 : vector<1x288xi1> to vector<1x288xi1>
    %100 = vector.broadcast %99 : vector<1x288xi1> to vector<4x288xi1>
    %101 = vector.broadcast %cst_51 : f32 to vector<4x288xf32>
    %102 = arith.select %100, %98, %101 : vector<4x288xi1>, vector<4x288xf32>
    %c6 = arith.constant 6 : index
    %c0_52 = arith.constant 0 : index
    %c0_53 = arith.constant 0 : index
    %103 = vector.load %arg5[%c6, %c0_52, %c0_53] : memref<9x8x4xf32, #tpu.memory_space<vmem>>, vector<1x8x4xf32>
    %104 = vector.shape_cast %103 : vector<1x8x4xf32> to vector<8x4xf32>
    %cst_54 = arith.constant dense<0.000000e+00> : vector<8x288xf32>
    %105 = tpu.matmul %104, %102, %cst_54 {dimension_numbers = #tpu.dot_dimension_numbers<[1], [0], [0], [1], [0, 0, 1, 1], [], []>} : vector<8x4xf32>, vector<4x288xf32>, vector<8x288xf32> -> vector<8x288xf32>
    %106 = arith.addf %97, %105 : vector<8x288xf32>
    %c0_55 = arith.constant 0 : index
    %c128_56 = arith.constant 128 : index
    %107 = vector.load %arg10[%c0_55, %c128_56] : memref<4x417xf32, #tpu.memory_space<vmem>>, vector<4x288xf32>
    %c7 = arith.constant 7 : index
    %c0_57 = arith.constant 0 : index
    %c0_58 = arith.constant 0 : index
    %108 = vector.load %arg5[%c7, %c0_57, %c0_58] : memref<9x8x4xf32, #tpu.memory_space<vmem>>, vector<1x8x4xf32>
    %109 = vector.shape_cast %108 : vector<1x8x4xf32> to vector<8x4xf32>
    %cst_59 = arith.constant dense<0.000000e+00> : vector<8x288xf32>
    %110 = tpu.matmul %109, %107, %cst_59 {dimension_numbers = #tpu.dot_dimension_numbers<[1], [0], [0], [1], [0, 0, 1, 1], [], []>} : vector<8x4xf32>, vector<4x288xf32>, vector<8x288xf32> -> vector<8x288xf32>
    %111 = arith.addf %106, %110 : vector<8x288xf32>
    %c0_60 = arith.constant 0 : index
    %c129 = arith.constant 129 : index
    %112 = vector.load %arg10[%c0_60, %c129] : memref<4x417xf32, #tpu.memory_space<vmem>>, vector<4x288xf32>
    %cst_61 = arith.constant 0.000000e+00 : f32
    %113 = vector.shape_cast %20 : vector<1x288xi1> to vector<1x288xi1>
    %114 = vector.broadcast %113 : vector<1x288xi1> to vector<4x288xi1>
    %115 = vector.broadcast %cst_61 : f32 to vector<4x288xf32>
    %116 = arith.select %114, %112, %115 : vector<4x288xi1>, vector<4x288xf32>
    %c8 = arith.constant 8 : index
    %c0_62 = arith.constant 0 : index
    %c0_63 = arith.constant 0 : index
    %117 = vector.load %arg5[%c8, %c0_62, %c0_63] : memref<9x8x4xf32, #tpu.memory_space<vmem>>, vector<1x8x4xf32>
    %118 = vector.shape_cast %117 : vector<1x8x4xf32> to vector<8x4xf32>
    %cst_64 = arith.constant dense<0.000000e+00> : vector<8x288xf32>
    %119 = tpu.matmul %118, %116, %cst_64 {dimension_numbers = #tpu.dot_dimension_numbers<[1], [0], [0], [1], [0, 0, 1, 1], [], []>} : vector<8x4xf32>, vector<4x288xf32>, vector<8x288xf32> -> vector<8x288xf32>
    %120 = arith.addf %111, %119 : vector<8x288xf32>
    %cst_65 = arith.constant 0.000000e+00 : f32
    %121 = vector.broadcast %cst_65 : f32 to vector<8x288xf32>
    %122 = arith.maximumf %120, %121 : vector<8x288xf32>
    %c0_66 = arith.constant 0 : index
    %c128_67 = arith.constant 128 : index
    %123 = vector.load %arg11[%c0_66, %c128_67] : memref<8x417xf32, #tpu.memory_space<vmem>>, vector<8x288xf32>
    tpu.vector_store %arg11[%c0_66, %c128_67], %122 {strides = array<i32>} : memref<8x417xf32, #tpu.memory_space<vmem>>, vector<8x288xf32>,
    %c0_i32_68 = arith.constant 0 : i32
    %124 = arith.cmpi eq, %arg1, %c0_i32_68 : i32
    %125 = arith.extui %124 : i1 to i32
    %c0_i32_69 = arith.constant 0 : i32
    %126 = arith.cmpi ne, %125, %c0_i32_69 : i32
    scf.if %126 {
      %cst_132 = arith.constant 0.000000e+00 : f32
      %207 = vector.broadcast %cst_132 : f32 to vector<8x16xf32>
      %c0_133 = arith.constant 0 : index
      %c128_134 = arith.constant 128 : index
      %208 = vector.load %arg11[%c0_133, %c128_134] : memref<8x417xf32, #tpu.memory_space<vmem>>, vector<8x16xf32>
      tpu.vector_store %arg11[%c0_133, %c128_134], %207 {strides = array<i32>} : memref<8x417xf32, #tpu.memory_space<vmem>>, vector<8x16xf32>,
    } else {
    }
    %c0_i32_70 = arith.constant 0 : i32
    %127 = arith.cmpi eq, %arg1, %c0_i32_70 : i32
    %128 = arith.extui %127 : i1 to i32
    %c0_i32_71 = arith.constant 0 : i32
    %129 = arith.cmpi ne, %128, %c0_i32_71 : i32
    scf.if %129 {
      %cst_132 = arith.constant 0.000000e+00 : f32
      %207 = vector.broadcast %cst_132 : f32 to vector<8x16xf32>
      %c0_133 = arith.constant 0 : index
      %c400 = arith.constant 400 : index
      %208 = vector.load %arg11[%c0_133, %c400] : memref<8x417xf32, #tpu.memory_space<vmem>>, vector<8x16xf32>
      tpu.vector_store %arg11[%c0_133, %c400], %207 {strides = array<i32>} : memref<8x417xf32, #tpu.memory_space<vmem>>, vector<8x16xf32>,
    } else {
    }
    %c0_72 = arith.constant 0 : index
    %c0_73 = arith.constant 0 : index
    %130 = vector.load %arg8[%c0_72, %c0_73] : memref<8x1xf32, #tpu.memory_space<vmem>>, vector<8x1xf32>
    %131 = vector.shape_cast %130 : vector<8x1xf32> to vector<8x1xf32>
    %132 = vector.broadcast %131 : vector<8x1xf32> to vector<8x256xf32>
    %c0_74 = arith.constant 0 : index
    %c127_75 = arith.constant 127 : index
    %133 = vector.load %arg11[%c0_74, %c127_75] : memref<8x417xf32, #tpu.memory_space<vmem>>, vector<8x256xf32>
    %cst_76 = arith.constant 0.000000e+00 : f32
    %134 = vector.shape_cast %39 : vector<1x256xi1> to vector<1x256xi1>
    %135 = vector.broadcast %134 : vector<1x256xi1> to vector<8x256xi1>
    %136 = vector.broadcast %cst_76 : f32 to vector<8x256xf32>
    %137 = arith.select %135, %133, %136 : vector<8x256xi1>, vector<8x256xf32>
    %c0_77 = arith.constant 0 : index
    %c0_78 = arith.constant 0 : index
    %c0_79 = arith.constant 0 : index
    %138 = vector.load %arg7[%c0_77, %c0_78, %c0_79] : memref<9x8x8xf32, #tpu.memory_space<vmem>>, vector<1x8x8xf32>
    %139 = vector.shape_cast %138 : vector<1x8x8xf32> to vector<8x8xf32>
    %cst_80 = arith.constant dense<0.000000e+00> : vector<8x256xf32>
    %140 = tpu.matmul %139, %137, %cst_80 {dimension_numbers = #tpu.dot_dimension_numbers<[1], [0], [0], [1], [0, 0, 1, 1], [], []>} : vector<8x8xf32>, vector<8x256xf32>, vector<8x256xf32> -> vector<8x256xf32>
    %141 = arith.addf %132, %140 : vector<8x256xf32>
    %c0_81 = arith.constant 0 : index
    %c128_82 = arith.constant 128 : index
    %142 = vector.load %arg11[%c0_81, %c128_82] : memref<8x417xf32, #tpu.memory_space<vmem>>, vector<8x256xf32>
    %c1_83 = arith.constant 1 : index
    %c0_84 = arith.constant 0 : index
    %c0_85 = arith.constant 0 : index
    %143 = vector.load %arg7[%c1_83, %c0_84, %c0_85] : memref<9x8x8xf32, #tpu.memory_space<vmem>>, vector<1x8x8xf32>
    %144 = vector.shape_cast %143 : vector<1x8x8xf32> to vector<8x8xf32>
    %cst_86 = arith.constant dense<0.000000e+00> : vector<8x256xf32>
    %145 = tpu.matmul %144, %142, %cst_86 {dimension_numbers = #tpu.dot_dimension_numbers<[1], [0], [0], [1], [0, 0, 1, 1], [], []>} : vector<8x8xf32>, vector<8x256xf32>, vector<8x256xf32> -> vector<8x256xf32>
    %146 = arith.addf %141, %145 : vector<8x256xf32>
    %c0_87 = arith.constant 0 : index
    %c129_88 = arith.constant 129 : index
    %147 = vector.load %arg11[%c0_87, %c129_88] : memref<8x417xf32, #tpu.memory_space<vmem>>, vector<8x256xf32>
    %cst_89 = arith.constant 0.000000e+00 : f32
    %148 = vector.shape_cast %41 : vector<1x256xi1> to vector<1x256xi1>
    %149 = vector.broadcast %148 : vector<1x256xi1> to vector<8x256xi1>
    %150 = vector.broadcast %cst_89 : f32 to vector<8x256xf32>
    %151 = arith.select %149, %147, %150 : vector<8x256xi1>, vector<8x256xf32>
    %c2_90 = arith.constant 2 : index
    %c0_91 = arith.constant 0 : index
    %c0_92 = arith.constant 0 : index
    %152 = vector.load %arg7[%c2_90, %c0_91, %c0_92] : memref<9x8x8xf32, #tpu.memory_space<vmem>>, vector<1x8x8xf32>
    %153 = vector.shape_cast %152 : vector<1x8x8xf32> to vector<8x8xf32>
    %cst_93 = arith.constant dense<0.000000e+00> : vector<8x256xf32>
    %154 = tpu.matmul %153, %151, %cst_93 {dimension_numbers = #tpu.dot_dimension_numbers<[1], [0], [0], [1], [0, 0, 1, 1], [], []>} : vector<8x8xf32>, vector<8x256xf32>, vector<8x256xf32> -> vector<8x256xf32>
    %155 = arith.addf %146, %154 : vector<8x256xf32>
    %c0_94 = arith.constant 0 : index
    %c143 = arith.constant 143 : index
    %156 = vector.load %arg11[%c0_94, %c143] : memref<8x417xf32, #tpu.memory_space<vmem>>, vector<8x256xf32>
    %cst_95 = arith.constant 0.000000e+00 : f32
    %157 = vector.shape_cast %39 : vector<1x256xi1> to vector<1x256xi1>
    %158 = vector.broadcast %157 : vector<1x256xi1> to vector<8x256xi1>
    %159 = vector.broadcast %cst_95 : f32 to vector<8x256xf32>
    %160 = arith.select %158, %156, %159 : vector<8x256xi1>, vector<8x256xf32>
    %c3_96 = arith.constant 3 : index
    %c0_97 = arith.constant 0 : index
    %c0_98 = arith.constant 0 : index
    %161 = vector.load %arg7[%c3_96, %c0_97, %c0_98] : memref<9x8x8xf32, #tpu.memory_space<vmem>>, vector<1x8x8xf32>
    %162 = vector.shape_cast %161 : vector<1x8x8xf32> to vector<8x8xf32>
    %cst_99 = arith.constant dense<0.000000e+00> : vector<8x256xf32>
    %163 = tpu.matmul %162, %160, %cst_99 {dimension_numbers = #tpu.dot_dimension_numbers<[1], [0], [0], [1], [0, 0, 1, 1], [], []>} : vector<8x8xf32>, vector<8x256xf32>, vector<8x256xf32> -> vector<8x256xf32>
    %164 = arith.addf %155, %163 : vector<8x256xf32>
    %c0_100 = arith.constant 0 : index
    %c144 = arith.constant 144 : index
    %165 = vector.load %arg11[%c0_100, %c144] : memref<8x417xf32, #tpu.memory_space<vmem>>, vector<8x256xf32>
    %c4_101 = arith.constant 4 : index
    %c0_102 = arith.constant 0 : index
    %c0_103 = arith.constant 0 : index
    %166 = vector.load %arg7[%c4_101, %c0_102, %c0_103] : memref<9x8x8xf32, #tpu.memory_space<vmem>>, vector<1x8x8xf32>
    %167 = vector.shape_cast %166 : vector<1x8x8xf32> to vector<8x8xf32>
    %cst_104 = arith.constant dense<0.000000e+00> : vector<8x256xf32>
    %168 = tpu.matmul %167, %165, %cst_104 {dimension_numbers = #tpu.dot_dimension_numbers<[1], [0], [0], [1], [0, 0, 1, 1], [], []>} : vector<8x8xf32>, vector<8x256xf32>, vector<8x256xf32> -> vector<8x256xf32>
    %169 = arith.addf %164, %168 : vector<8x256xf32>
    %c0_105 = arith.constant 0 : index
    %c145 = arith.constant 145 : index
    %170 = vector.load %arg11[%c0_105, %c145] : memref<8x417xf32, #tpu.memory_space<vmem>>, vector<8x256xf32>
    %cst_106 = arith.constant 0.000000e+00 : f32
    %171 = vector.shape_cast %41 : vector<1x256xi1> to vector<1x256xi1>
    %172 = vector.broadcast %171 : vector<1x256xi1> to vector<8x256xi1>
    %173 = vector.broadcast %cst_106 : f32 to vector<8x256xf32>
    %174 = arith.select %172, %170, %173 : vector<8x256xi1>, vector<8x256xf32>
    %c5_107 = arith.constant 5 : index
    %c0_108 = arith.constant 0 : index
    %c0_109 = arith.constant 0 : index
    %175 = vector.load %arg7[%c5_107, %c0_108, %c0_109] : memref<9x8x8xf32, #tpu.memory_space<vmem>>, vector<1x8x8xf32>
    %176 = vector.shape_cast %175 : vector<1x8x8xf32> to vector<8x8xf32>
    %cst_110 = arith.constant dense<0.000000e+00> : vector<8x256xf32>
    %177 = tpu.matmul %176, %174, %cst_110 {dimension_numbers = #tpu.dot_dimension_numbers<[1], [0], [0], [1], [0, 0, 1, 1], [], []>} : vector<8x8xf32>, vector<8x256xf32>, vector<8x256xf32> -> vector<8x256xf32>
    %178 = arith.addf %169, %177 : vector<8x256xf32>
    %c0_111 = arith.constant 0 : index
    %c159 = arith.constant 159 : index
    %179 = vector.load %arg11[%c0_111, %c159] : memref<8x417xf32, #tpu.memory_space<vmem>>, vector<8x256xf32>
    %cst_112 = arith.constant 0.000000e+00 : f32
    %180 = vector.shape_cast %39 : vector<1x256xi1> to vector<1x256xi1>
    %181 = vector.broadcast %180 : vector<1x256xi1> to vector<8x256xi1>
    %182 = vector.broadcast %cst_112 : f32 to vector<8x256xf32>
    %183 = arith.select %181, %179, %182 : vector<8x256xi1>, vector<8x256xf32>
    %c6_113 = arith.constant 6 : index
    %c0_114 = arith.constant 0 : index
    %c0_115 = arith.constant 0 : index
    %184 = vector.load %arg7[%c6_113, %c0_114, %c0_115] : memref<9x8x8xf32, #tpu.memory_space<vmem>>, vector<1x8x8xf32>
    %185 = vector.shape_cast %184 : vector<1x8x8xf32> to vector<8x8xf32>
    %cst_116 = arith.constant dense<0.000000e+00> : vector<8x256xf32>
    %186 = tpu.matmul %185, %183, %cst_116 {dimension_numbers = #tpu.dot_dimension_numbers<[1], [0], [0], [1], [0, 0, 1, 1], [], []>} : vector<8x8xf32>, vector<8x256xf32>, vector<8x256xf32> -> vector<8x256xf32>
    %187 = arith.addf %178, %186 : vector<8x256xf32>
    %c0_117 = arith.constant 0 : index
    %c160 = arith.constant 160 : index
    %188 = vector.load %arg11[%c0_117, %c160] : memref<8x417xf32, #tpu.memory_space<vmem>>, vector<8x256xf32>
    %c7_118 = arith.constant 7 : index
    %c0_119 = arith.constant 0 : index
    %c0_120 = arith.constant 0 : index
    %189 = vector.load %arg7[%c7_118, %c0_119, %c0_120] : memref<9x8x8xf32, #tpu.memory_space<vmem>>, vector<1x8x8xf32>
    %190 = vector.shape_cast %189 : vector<1x8x8xf32> to vector<8x8xf32>
    %cst_121 = arith.constant dense<0.000000e+00> : vector<8x256xf32>
    %191 = tpu.matmul %190, %188, %cst_121 {dimension_numbers = #tpu.dot_dimension_numbers<[1], [0], [0], [1], [0, 0, 1, 1], [], []>} : vector<8x8xf32>, vector<8x256xf32>, vector<8x256xf32> -> vector<8x256xf32>
    %192 = arith.addf %187, %191 : vector<8x256xf32>
    %c0_122 = arith.constant 0 : index
    %c161 = arith.constant 161 : index
    %193 = vector.load %arg11[%c0_122, %c161] : memref<8x417xf32, #tpu.memory_space<vmem>>, vector<8x256xf32>
    %cst_123 = arith.constant 0.000000e+00 : f32
    %194 = vector.shape_cast %41 : vector<1x256xi1> to vector<1x256xi1>
    %195 = vector.broadcast %194 : vector<1x256xi1> to vector<8x256xi1>
    %196 = vector.broadcast %cst_123 : f32 to vector<8x256xf32>
    %197 = arith.select %195, %193, %196 : vector<8x256xi1>, vector<8x256xf32>
    %c8_124 = arith.constant 8 : index
    %c0_125 = arith.constant 0 : index
    %c0_126 = arith.constant 0 : index
    %198 = vector.load %arg7[%c8_124, %c0_125, %c0_126] : memref<9x8x8xf32, #tpu.memory_space<vmem>>, vector<1x8x8xf32>
    %199 = vector.shape_cast %198 : vector<1x8x8xf32> to vector<8x8xf32>
    %cst_127 = arith.constant dense<0.000000e+00> : vector<8x256xf32>
    %200 = tpu.matmul %199, %197, %cst_127 {dimension_numbers = #tpu.dot_dimension_numbers<[1], [0], [0], [1], [0, 0, 1, 1], [], []>} : vector<8x8xf32>, vector<8x256xf32>, vector<8x256xf32> -> vector<8x256xf32>
    %201 = arith.addf %192, %200 : vector<8x256xf32>
    %cst_128 = arith.constant 0.000000e+00 : f32
    %202 = vector.broadcast %cst_128 : f32 to vector<8x256xf32>
    %203 = arith.maximumf %201, %202 : vector<8x256xf32>
    %c0_129 = arith.constant 0 : index
    %c0_130 = arith.constant 0 : index
    %c0_131 = arith.constant 0 : index
    %204 = vector.load %arg9[%c0_129, %c0_130, %c0_131] : memref<1x8x256xf32, #tpu.memory_space<vmem>>, vector<1x8x256xf32>
    %205 = vector.shape_cast %204 : vector<1x8x256xf32> to vector<8x256xf32>
    %206 = vector.shape_cast %203 : vector<8x256xf32> to vector<1x8x256xf32>
    tpu.vector_store %arg9[%c0_129, %c0_130, %c0_131], %206 {strides = array<i32>} : memref<1x8x256xf32, #tpu.memory_space<vmem>>, vector<1x8x256xf32>,
    return
  }
  func.func @transform_0(%arg0: i32, %arg1: i32) -> (i32, i32, i32) {
    %c0_i32 = arith.constant 0 : i32
    %c0_i32_0 = arith.constant 0 : i32
    return %arg0, %c0_i32, %arg1 : i32, i32, i32
  }
  func.func @transform_1(%arg0: i32, %arg1: i32) -> (i32, i32, i32) {
    %c2_i32 = arith.constant 2 : i32
    %0 = arith.muli %arg1, %c2_i32 : i32
    %c1_i32 = arith.constant 1 : i32
    %1 = arith.subi %0, %c1_i32 : i32
    %c0_i32 = arith.constant 0 : i32
    %2 = arith.maxsi %1, %c0_i32 : i32
    %c0_i32_0 = arith.constant 0 : i32
    %c0_i32_1 = arith.constant 0 : i32
    return %arg0, %c0_i32_0, %2 : i32, i32, i32
  }
  func.func @transform_2(%arg0: i32, %arg1: i32) -> (i32, i32, i32) {
    %c1_i32 = arith.constant 1 : i32
    %0 = arith.addi %arg1, %c1_i32 : i32
    %c2_i32 = arith.constant 2 : i32
    %1 = arith.muli %0, %c2_i32 : i32
    %c1_i32_0 = arith.constant 1 : i32
    %2 = arith.minsi %1, %c1_i32_0 : i32
    %c0_i32 = arith.constant 0 : i32
    %c0_i32_1 = arith.constant 0 : i32
    return %arg0, %c0_i32, %2 : i32, i32, i32
  }
  func.func @transform_3(%arg0: i32, %arg1: i32) -> (i32, i32, i32) {
    %c0_i32 = arith.constant 0 : i32
    %c0_i32_0 = arith.constant 0 : i32
    %c0_i32_1 = arith.constant 0 : i32
    %c0_i32_2 = arith.constant 0 : i32
    return %c0_i32, %c0_i32_0, %c0_i32_1 : i32, i32, i32
  }
  func.func @transform_4(%arg0: i32, %arg1: i32) -> (i32, i32) {
    %c0_i32 = arith.constant 0 : i32
    %c0_i32_0 = arith.constant 0 : i32
    %c0_i32_1 = arith.constant 0 : i32
    return %c0_i32, %c0_i32_0 : i32, i32
  }
  func.func @transform_5(%arg0: i32, %arg1: i32) -> (i32, i32, i32) {
    %c0_i32 = arith.constant 0 : i32
    %c0_i32_0 = arith.constant 0 : i32
    %c0_i32_1 = arith.constant 0 : i32
    %c0_i32_2 = arith.constant 0 : i32
    return %c0_i32, %c0_i32_0, %c0_i32_1 : i32, i32, i32
  }
  func.func @transform_6(%arg0: i32, %arg1: i32) -> (i32, i32) {
    %c0_i32 = arith.constant 0 : i32
    %c0_i32_0 = arith.constant 0 : i32
    %c0_i32_1 = arith.constant 0 : i32
    return %c0_i32, %c0_i32_0 : i32, i32
  }
  func.func @transform_7(%arg0: i32, %arg1: i32) -> (i32, i32, i32) {
    %c0_i32 = arith.constant 0 : i32
    %c0_i32_0 = arith.constant 0 : i32
    return %arg0, %c0_i32, %arg1 : i32, i32, i32
  }
}

</mosaic_0001>

<bundles_post_ra>
// kernel: tpu_custom_call.1
= control target key start
LH: loop header
LB: loop body
LE: loop exit
PB: predicated region body
PF: predicated region fallthrough
CT: control target
= control target key end

     0   :  { %12 = vsyncpa [#allocation5], 0  ;;  %s2808_s0 = inlined_call_operand.vmem [shape: f32[2,4,256], index: 0, kind: input, shape index: {}]   ;;  %s2809_s1 = inlined_call_operand.vmem [shape: f32[2,4,256], index: 1, kind: input, shape index: {}]   ;;  %s2810_s2 = inlined_call_operand.vmem [shape: f32[2,4,256], index: 2, kind: input, shape index: {}]   ;;  %s2811_s3 = inlined_call_operand.vmem [shape: f32[9,8,4], index: 3, kind: input, shape index: {}]   ;;  %s2812_s4 = inlined_call_operand.vmem [shape: f32[8,1], index: 4, kind: input, shape index: {}]   ;;  %s2813_s5 = inlined_call_operand.vmem [shape: f32[9,8,8], index: 5, kind: input, shape index: {}]   ;;  %s2814_s6 = inlined_call_operand.vmem [shape: f32[8,1], index: 6, kind: input, shape index: {}]   ;;  %s2815_s7 = inlined_call_operand.hbm [shape: f32[2,8,256], index: 7, kind: output, shape index: {}]  }
   0x1   :  { %14 = vsyncpa [#allocation5 + $0x1], 0  ;;  %s2421_s1 = smov 0   ;;  %s2423_s2 = smov 0  }
   0x2   :  { %s2425_s24 = smov 0   ;;  %s2427_s25 = smov 0  }
   0x3   :  { %s2429_s26 = smov 0   ;;  %s2431_s27 = smov 0  }
   0x4 LB: > { %s2086_s28 = sadd.s32 4294967295, %s2363_s27   ;;  %s2087_s29 = sadd.s32 4294967294, %s2363_s27   ;;  %s2363_s27 = sphi %s2431_s27, %s20_s27   ;;  %s2359_s26 = sphi %s2429_s26, %s2834_s26   ;;  %s2355_s25 = sphi %s2427_s25, %s2833_s25   ;;  %s2351_s24 = sphi %s2425_s24, %s2832_s24   ;;  %s2347_s2 = sphi %s2423_s2, %s2831_s2   ;;  %s2343_s1 = sphi %s2421_s1, %s2830_s1  }
   0x5   : > { %s32_s30 = sadd.s32 1, %s2359_s26  ;;  %s225_s8 = sadd.s32 1, %s2351_s24 }
   0x6   : > { %p34_p0 = scmp.ge.s32.totalorder %s32_s30, 2  ;;  %p235_p1 = scmp.ne.s32.totalorder %s2351_s24, %s2347_s2 }
   0x7   : > { %p236_p2 = scmp.eq.s32.totalorder %s2086_s28, 1  ;;  %p241_p3 = scmp.ne.s32.totalorder %s2347_s2, %s2343_s1 }
   0x8   : > { %s2836_s30 = smov (%p34_p0, %s32_s30), 0  ;;  %p242_p5 = scmp.eq.s32.totalorder %s2087_s29, 1 }
   0x9   : > { %p2461_p4 = por %p236_p2, %p235_p1  ;;  %s220_s10 = ssub.s32 %s2359_s26, %s2836_s30 }
   0xa   : > { %p2090_p6 = scmp.ge.s32.totalorder %s2363_s27, 1  ;;  %p223_p7 = scmp.eq.s32.totalorder %s220_s10, 0 }
   0xb   : > { %p2468_p8 = por %p242_p5, %p241_p3  ;;  %p323_p9 = scmp.lt.s32.totalorder %s2363_s27, 3 }
   0xc   : > { %s2474_s12 = scalar_select %p223_p7, %s2351_s24, %s225_s8  }
   0xd   : > { %p324_p10 = pnand %p2090_p6, %p323_p9 }
   0xe   : > { %p384_p11 = scmp.lt.s32.totalorder (!%p324_p10), %s2355_s25, 1  ;;  %s2366_s18 = smov (!%p324_p10), 33  }
   0xf   : > { %327 = sbr.rel (%p324_p10) target bundleno = 668 (0x29c), region = 48  ;;  %s2367_s19 = smov (!%p324_p10), 32  }
  0x10   : > { %s2368_s20 = smov (!%p324_p10), 31   ;;  %s2369_s21 = smov (!%p324_p10), 17  }
  0x11   : > { %s2370_s22 = smov (!%p324_p10), 16   ;;  %s2371_s23 = smov (!%p324_p10), 15  }
  0x12   : > { %s2372_s28 = smov (!%p324_p10), 1   ;;  %s2373_s29 = smov (!%p324_p10), 127  }
  0x13   : > { %s2200_s16 = sshll.u32 (!%p324_p10), %s2355_s25, 4  ;;  %s2305_s10 = scalar_lea.hbm (!%p324_p10), %s2815_s7, 32 }
  0x14   : > { %vm472_vm0 = vcmask 1044224   ;;  %vm476_vm1 = vcmask 257024   ;;  %v2365_v0 = vmov 0.0   ;;  %s385_s13 = scalar_select %p384_p11, %s2355_s25, 1  ;;  %v426_v40 = vlaneseq  ;;  %v515_v51 = vld [vmem:[%s2811_s3] sm:$0xff]  ;;  %v2176_v55 = vld [vmem:[%s2813_s5 + $0x28] sm:$0xff] }
  0x15   : > { %473 = vst.msk [vmem:[#allocation2] sm:$0xf] %vm472_vm0, %v2365_v0  ;;  %vm520_vm3 = vcmask 1043456   ;;  %vm516_vm4 = vcmask 31744   ;;  %vm506_vm5 = vcmask 269312   ;;  %vm611_vm6 = vcmask 261120  }
  0x16   : > { %477 = vst.msk [vmem:[#allocation2 + $0xc] sm:$0xf] %vm476_vm1, %v2365_v0  ;;  %s2199_s14 = sshll.u32 %s385_s13, 3  ;;  %v427_v42 = vand.u32 127, %v426_v40  ;;  %vm711_vm9 = vcmask 252928   ;;  %vm817_vm12 = vcmask 138240  }
  0x17   : > { %s391_s17 = scalar_lea.vmem %s2808_s0, %s2199_s14  ;;  %vm925_vm14 = vcmask 130048   ;;  %vm1020_vm15 = vcmask 121856   ;;  %vm1126_vm0 = vcmask 7168   ;;  %vm1313_vm1 = vcmask 1039360   ;;  %s380_s14 = sand.u32 1, %s2347_s2  }
  0x18   : > { %v2483_v1 = vld [vmem:[%s391_s17] sm:$0xff]  ;;  %v429_v43 = vadd.s32 256, %v427_v42  ;;  %v428_v48 = vadd.s32 128, %v427_v42  ;;  %v434_v52 = vand.u32 15, %v427_v42  ;;  %s2091_s15 = sshll.u32 %s380_s14, 4  ;;  %s1956_s25 = scalar_lea.sflag [#allocation5], %s380_s14 }
  0x19   : > { %475 = vst [vmem:[#allocation2 + $0x4] sm:$0xff] %v2483_v1 }
  0x1a   : > { %v448_v44 = vand.u32 15, %v429_v43  ;;  %v441_v53 = vand.u32 15, %v428_v48  ;;  %vm2512_vm7 = vcmp.ge.s32.totalorder %v434_v52, 1  ;;  %vm2537_vm10 = vcmp.le.s32.totalorder %v434_v52, 14 }
  0x1c   : > { %vm2501_vm2 = vcmp.ge.s32.totalorder %v448_v44, 1  ;;  %vm2516_vm8 = vcmp.ge.s32.totalorder %v441_v53, 1  ;;  %vm2541_vm11 = vcmp.le.s32.totalorder %v441_v53, 14  ;;  %vm2560_vm13 = vcmp.le.s32.totalorder %v448_v44, 14 }
  0x1d   : > { %v1214_v28 = vld [vmem:[#allocation2 + $0xc] sm:$0xf] }
  0x1e   : > { %v1298_v33 = vld [vmem:[#allocation2 + $0xc] sm:$0xf] }
  0x20   : > { %v485_v2 = vld [vmem:[#allocation2 + $0x8] sm:$0xf]  ;;  %v484_v3 = vld [vmem:[#allocation2] sm:$0xff] }
  0x21   : > { %496 = vst [vmem:[#allocation1 + $0x10] ss:$2 sm:$0xff] %v485_v2  ;;  %v594_v5 = vld [vmem:[#allocation2 + $0x8] sm:$0xf]  ;;  %v2100_v2 = vld [vmem:[%s2811_s3 + $0x8] sm:$0xff] }
  0x22   : > { %494 = vst [vmem:[#allocation1] ss:$2 sm:$0xff] %v484_v3  ;;  %v687_v8 = vld [vmem:[#allocation2 + $0x8] sm:$0xff] }
  0x28   : > { %v499_v4 = vld.sshfl [vmem:[#allocation1 + $0x10] sm:$0xff pattern:$0x75316420] }
  0x29   : > { %504 = vrot.lane.b32.xlu1 %v499_v4, %s2366_s18  ;;  %v497_v6 = vld.sshfl [vmem:[#allocation1] sm:$0xff pattern:$0x75316420]  ;;  %v498_v7 = vld.sshfl [vmem:[#allocation1 + $0x8] sm:$0xff pattern:$0x75316420] }
  0x2a   : > { %500 = vrot.lane.b32.xlu0 %v497_v6, %s2366_s18  ;;  %599 = vst [vmem:[#allocation1] ss:$2 sm:$0xff] %v484_v3 }
  0x2b   : > { %601 = vst [vmem:[#allocation1 + $0x10] ss:$2 sm:$0xff] %v594_v5 }
  0x31   : > { %v603_v9 = vld.sshfl [vmem:[#allocation1 + $0x8] sm:$0xff pattern:$0x75316420]  ;;  %v602_v10 = vld.sshfl [vmem:[#allocation1] sm:$0xff pattern:$0x75316420] }
  0x32   : > { %502 = vrot.lane.b32.xlu0 %v498_v7, %s2366_s18  ;;  %607 = vrot.lane.b32.xlu1 %v603_v9, %s2367_s19  ;;  %696 = vst [vmem:[#allocation1] ss:$2 sm:$0xff] %v484_v3  ;;  %v604_v11 = vld.sshfl [vmem:[#allocation1 + $0x10] sm:$0xff pattern:$0x75316420]  ;;  %s2375_s18 = smov 113  }
  0x33   : > { %609 = vrot.lane.b32.xlu2 %v604_v11, %s2367_s19  ;;  %698 = vst [vmem:[#allocation1 + $0x10] ss:$2 sm:$0xff] %v687_v8 }
  0x39   : > { %v700_v12 = vld.sshfl [vmem:[#allocation1 + $0x8] sm:$0xff pattern:$0x75316420]  ;;  %v699_v13 = vld.sshfl [vmem:[#allocation1] sm:$0xff pattern:$0x75316420] }
  0x3a   : > { %705 = vrot.lane.b32.xlu1 %v700_v12, %s2368_s20  ;;  %703 = vrot.lane.b32.xlu0 %v699_v13, %s2368_s20  ;;  %802 = vst [vmem:[#allocation1] ss:$2 sm:$0xff] %v484_v3  ;;  %v701_v14 = vld.sshfl [vmem:[#allocation1 + $0x10] sm:$0xff pattern:$0x75316420] }
  0x3b   : > { %v702_v15 = vld.sshfl [vmem:[#allocation1 + $0x18] sm:$0xff pattern:$0x75316420]  ;;  %605 = vrot.lane.b32.xlu2 %v602_v10, %s2367_s19  ;;  %v2107_v10 = vld [vmem:[%s2811_s3 + $0x10] sm:$0xff]  ;;  %s2376_s19 = smov 111  }
  0x3c   : > { %804 = vst [vmem:[#allocation1 + $0x10] ss:$2 sm:$0xff] %v687_v8 }
  0x41   : > { %v805_v16 = vld.sshfl [vmem:[#allocation1] sm:$0xff pattern:$0x75316420]  ;;  %v806_v17 = vld.sshfl [vmem:[#allocation1 + $0x8] sm:$0xff pattern:$0x75316420] }
  0x42   : > { %709 = vrot.lane.b32.xlu0 %v702_v15, %s2368_s20  ;;  %809 = vrot.lane.b32.xlu1 %v805_v16, %s2369_s21  ;;  %910 = vst [vmem:[#allocation1] ss:$2 sm:$0xff] %v484_v3 }
  0x43   : > { %v807_v18 = vld.sshfl [vmem:[#allocation1 + $0x10] sm:$0xff pattern:$0x75316420]  ;;  %707 = vrot.lane.b32.xlu2 %v701_v14, %s2368_s20  ;;  %v808_v19 = vld.sshfl [vmem:[#allocation1 + $0x18] sm:$0xff pattern:$0x75316420] }
  0x44   : > { %912 = vst [vmem:[#allocation1 + $0x10] ss:$2 sm:$0xff] %v687_v8  ;;  %s2377_s20 = smov 97  }
  0x49   : > { %v914_v20 = vld.sshfl [vmem:[#allocation1 + $0x8] sm:$0xff pattern:$0x75316420]  ;;  %v913_v21 = vld.sshfl [vmem:[#allocation1] sm:$0xff pattern:$0x75316420] }
  0x4a   : > { %813 = vrot.lane.b32.xlu0 %v807_v18, %s2369_s21  ;;  %917 = vrot.lane.b32.xlu1 %v913_v21, %s2370_s22  ;;  %1005 = vst [vmem:[#allocation1] ss:$2 sm:$0xff] %v484_v3  ;;  %v2114_v21 = vld [vmem:[%s2811_s3 + $0x18] sm:$0xff] }
  0x4b   : > { %v915_v22 = vld.sshfl [vmem:[#allocation1 + $0x10] sm:$0xff pattern:$0x75316420]  ;;  %v916_v23 = vld.sshfl [vmem:[#allocation1 + $0x18] sm:$0xff pattern:$0x75316420]  ;;  %811 = vrot.lane.b32.xlu2 %v806_v17, %s2369_s21 }
  0x4c   : > { %1007 = vst [vmem:[#allocation1 + $0x10] ss:$2 sm:$0xff] %v687_v8 }
  0x51   : > { %v1009_v24 = vld.sshfl [vmem:[#allocation1 + $0x8] sm:$0xff pattern:$0x75316420]  ;;  %v1008_v25 = vld.sshfl [vmem:[#allocation1] sm:$0xff pattern:$0x75316420] }
  0x52   : > { %815 = vrot.lane.b32.xlu0 %v808_v19, %s2369_s21  ;;  %921 = vrot.lane.b32.xlu1 %v915_v22, %s2370_s22  ;;  %1111 = vst [vmem:[#allocation1] ss:$2 sm:$0xff] %v484_v3  ;;  %v2374_v22 = vmov 0   ;;  %s2378_s21 = smov 112  }
  0x53   : > { %v1010_v26 = vld.sshfl [vmem:[#allocation1 + $0x10] sm:$0xff pattern:$0x75316420]  ;;  %919 = vrot.lane.b32.xlu2 %v914_v20, %s2370_s22  ;;  %v1011_v27 = vld.sshfl [vmem:[#allocation1 + $0x18] sm:$0xff pattern:$0x75316420]  ;;  %2283 = vset.pattern.permute.xlu1 %v2374_v22 }
  0x54   : > { %1113 = vst [vmem:[#allocation1 + $0x10] ss:$2 sm:$0xff] %v687_v8  ;;  %2272 = vset.pattern.permute.xlu2 %v2374_v22  ;;  %2284 = vset.pattern.permute.xlu0 %v2374_v22 }
  0x59   : > { %v1114_v29 = vld.sshfl [vmem:[#allocation1] sm:$0xff pattern:$0x75316420]  ;;  %v1115_v30 = vld.sshfl [vmem:[#allocation1 + $0x8] sm:$0xff pattern:$0x75316420] }
  0x5a   : > { %1016 = vrot.lane.b32.xlu1 %v1010_v26, %s2371_s23  ;;  %1014 = vrot.lane.b32.xlu0 %v1009_v24, %s2371_s23  ;;  %1219 = vst [vmem:[#allocation1] ss:$2 sm:$0xff] %v2483_v1 }
  0x5b   : > { %923 = vrot.lane.b32.xlu2 %v916_v23, %s2370_s22  ;;  %v1116_v31 = vld.sshfl [vmem:[#allocation1 + $0x10] sm:$0xff pattern:$0x75316420]  ;;  %v1117_v32 = vld.sshfl [vmem:[#allocation1 + $0x18] sm:$0xff pattern:$0x75316420] }
  0x5c   : > { %1221 = vst [vmem:[#allocation1 + $0x10] ss:$2 sm:$0xff] %v1214_v28  ;;  %v478_v23 = vld [vmem:[%s2812_s4] sm:$0xff]  ;;  %s2379_s22 = smov 95  }
  0x61   : > { %v2487_v34 = vld.sshfl [vmem:[#allocation1] sm:$0xff pattern:$0x75316420]  ;;  %v2489_v35 = vld.sshfl [vmem:[#allocation1 + $0x8] sm:$0xff pattern:$0x75316420] }
  0x62   : > { %1018 = vrot.lane.b32.xlu0 %v1011_v27, %s2371_s23  ;;  %1118 = vrot.lane.b32.xlu1 %v1114_v29, %s2372_s28  ;;  %1301 = vst [vmem:[#allocation1] ss:$2 sm:$0xff] %v2483_v1 }
  0x63   : > { %v2493_v36 = vld.sshfl [vmem:[#allocation1 + $0x10] sm:$0xff pattern:$0x75316420]  ;;  %1012 = vrot.lane.b32.xlu2 %v1008_v25, %s2371_s23 }
  0x64   : > { %1303 = vst [vmem:[#allocation1 + $0x10] ss:$2 sm:$0xff] %v1298_v33 }
  0x69   : > { %v1305_v37 = vld.sshfl [vmem:[#allocation1 + $0x8] sm:$0xff pattern:$0x75316420]  ;;  %v1304_v39 = vld.sshfl [vmem:[#allocation1] sm:$0xff pattern:$0x75316420] }
  0x6a   : > { %1122 = vrot.lane.b32.xlu0 %v1116_v31, %s2372_s28  ;;  %1124 = vrot.lane.b32.xlu1 %v1117_v32, %s2372_s28 }
  0x6b   : > { %1120 = vrot.lane.b32.xlu2 %v1115_v30, %s2372_s28  ;;  %v1306_v38 = vld.sshfl [vmem:[#allocation1 + $0x10] sm:$0xff pattern:$0x75316420]  ;;  %v2121_v30 = vld [vmem:[%s2811_s3 + $0x20] sm:$0xff] }
  0x72   : > { %1309 = vrot.lane.b32.xlu0 %v1305_v37, %s2373_s29  ;;  %1311 = vrot.lane.b32.xlu1 %v1306_v38, %s2373_s29 }
  0x73   : > { %1307 = vrot.lane.b32.xlu2 %v1304_v39, %s2373_s29 }
  0x7b   : > { %481 = vperm.xlu2 %2272, %v478_v23  }
  0x8d   : > { %v610_v41 = vpop.permute.xlu2 %609 }
  0x95   : > { %v606_v45 = vpop.permute.xlu2 %605 }
  0x9b   : > { %v505_v47 = vpop.permute.xlu1 %504 }
  0x9c   : > { %v501_v49 = vpop.permute.xlu0 %500  ;;  %v514_v50 = vsel %vm2501_vm2, %v505_v47, 0.0 }
  0x9d   : > { %2098 = vmatpush.msk.msra.mxu2 %vm520_vm3, %v514_v50  ;;  %v708_v54 = vpop.permute.xlu2 %707 }
  0x9e   : > { %2099 = vmatmul.msk.f32.vlgmr.msra.gmra.mxu2 %vm516_vm4, %v515_v51 }
  0xa4   : > { %v503_v57 = vpop.permute.xlu0 %502  ;;  %v608_v58 = vpop.permute.xlu1 %607 }
  0xa5   : > { %v507_v59 = vsel %vm506_vm5, %v501_v49, %v503_v57  ;;  %v508_v60 = vsel %vm506_vm5, %v503_v57, %v505_v47  ;;  %v612_v61 = vsel %vm611_vm6, %v606_v45, %v608_v58  ;;  %v613_v1 = vsel %vm611_vm6, %v608_v58, %v610_v41  ;;  %v812_v3 = vpop.permute.xlu2 %811  ;;  %v2128_v45 = vld [vmem:[%s2811_s3 + $0x28] sm:$0xff] }
  0xa6   : > { %v512_v62 = vsel %vm2512_vm7, %v507_v59, 0.0  ;;  %v513_v63 = vsel %vm2516_vm8, %v508_v60, 0.0  ;;  %2101 = vmatpush.msk.msra.mxu3 %vm520_vm3, %v612_v61  ;;  %vm1601_vm5 = vcmask 924672  }
  0xa7   : > { %2094 = vmatpush.msk.msra.mxu0 %vm520_vm3, %v512_v62  ;;  %2096 = vmatpush.msk.msra.mxu1 %vm520_vm3, %v513_v63 }
  0xa8   : > { %2095 = vmatmul.msk.f32.vlgmr.msra.gmra.mxu0 %vm516_vm4, %v515_v51  ;;  %2097 = vmatmul.msk.f32.vlgmr.msra.gmra.mxu1 %vm516_vm4, %v515_v51 }
  0xa9   : > { %2103 = vmatpush.msk.msrb.mxu0 %vm520_vm3, %v613_v1  ;;  %2105 = vmatpush.msk.msrb.mxu1 %vm520_vm3, %v610_v41 }
  0xaa   : > { %2102 = vmatmul.msk.f32.vlgmr.msra.gmra.mxu3 %vm516_vm4, %v2100_v2 }
  0xac   : > { %v706_v6 = vpop.permute.xlu1 %705  ;;  %v704_v7 = vpop.permute.xlu0 %703 }
  0xad   : > { %v713_v8 = vsel %vm711_vm9, %v706_v6, %v708_v54  ;;  %v712_v9 = vsel %vm711_vm9, %v704_v7, %v706_v6  ;;  %v920_v14 = vpop.permute.xlu2 %919 }
  0xae   : > { %v718_v11 = vsel %vm2537_vm10, %v712_v9, 0.0  ;;  %v719_v12 = vsel %vm2541_vm11, %v713_v8, 0.0  ;;  %v2149_v8 = vld [vmem:[%s2811_s3 + $0x40] sm:$0xff] }
  0xaf   : > { %2108 = vmatpush.msk.msrb.mxu2 %vm520_vm3, %v718_v11  ;;  %2110 = vmatpush.msk.msrb.mxu3 %vm520_vm3, %v719_v12 }
  0xb0   : > { %2109 = vmatmul.msk.f32.vlgmr.msrb.gmra.mxu2 %vm516_vm4, %v2107_v10  ;;  %2104 = vmatmul.msk.f32.vlgmr.msrb.gmra.mxu0 %vm516_vm4, %v2100_v2 }
  0xb1   : > { %2106 = vmatmul.msk.f32.vlgmr.msrb.gmra.mxu1 %vm516_vm4, %v2100_v2  ;;  %v2142_v2 = vld [vmem:[%s2811_s3 + $0x38] sm:$0xff] }
  0xb2   : > { %2111 = vmatmul.msk.f32.vlgmr.msrb.gmra.mxu3 %vm516_vm4, %v2107_v10 }
  0xb4   : > { %v710_v15 = vpop.permute.xlu0 %709  ;;  %v810_v16 = vpop.permute.xlu1 %809 }
  0xb5   : > { %v714_v17 = vsel %vm711_vm9, %v708_v54, %v710_v15  ;;  %v818_v18 = vsel %vm817_vm12, %v810_v16, %v812_v3  ;;  %v924_v29 = vpop.permute.xlu2 %923  ;;  %v2135_v54 = vld [vmem:[%s2811_s3 + $0x30] sm:$0xff]  ;;  %vm1719_vm9 = vcmask 908288  }
  0xb6   : > { %v720_v19 = vsel %vm2560_vm13, %v714_v17, 0.0  ;;  %v824_v20 = vsel %vm2512_vm7, %v818_v18, 0.0 }
  0xb7   : > { %2112 = vmatpush.msk.msra.mxu0 %vm520_vm3, %v720_v19  ;;  %2115 = vmatpush.msk.msra.mxu1 %vm520_vm3, %v824_v20  ;;  %v1418_v19 = vld [vmem:[#allocation3] sm:$0xff] }
  0xb8   : > { %2113 = vmatmul.msk.f32.vlgmr.msra.gmra.mxu0 %vm516_vm4, %v2107_v10  ;;  %1424 = vrot.lane.b32.xlu0 %v1418_v19, %s2372_s28 }
  0xb9   : > { %2116 = vmatmul.msk.f32.vlgmr.msra.gmra.mxu1 %vm516_vm4, %v2114_v21 }
  0xbc   : > { %v814_v24 = vpop.permute.xlu0 %813  ;;  %v918_v25 = vpop.permute.xlu1 %917 }
  0xbd   : > { %v819_v26 = vsel %vm817_vm12, %v812_v3, %v814_v24  ;;  %v926_v27 = vsel %vm925_vm14, %v918_v25, %v920_v14  ;;  %v1013_v40 = vpop.permute.xlu2 %1012 }
  0xbe   : > { %v825_v28 = vsel %vm2516_vm8, %v819_v26, 0.0  ;;  %2122 = vmatpush.msk.msrb.mxu0 %vm520_vm3, %v926_v27 }
  0xbf   : > { %2117 = vmatpush.msk.msra.mxu2 %vm520_vm3, %v825_v28 }
  0xc0   : > { %2118 = vmatmul.msk.f32.vlgmr.msra.gmra.mxu2 %vm516_vm4, %v2114_v21  ;;  %2123 = vmatmul.msk.f32.vlgmr.msrb.gmra.mxu0 %vm516_vm4, %v2121_v30 }
  0xc4   : > { %v816_v31 = vpop.permute.xlu0 %815  ;;  %v922_v32 = vpop.permute.xlu1 %921 }
  0xc5   : > { %v820_v33 = vsel %vm817_vm12, %v814_v24, %v816_v31  ;;  %v927_v37 = vsel %vm925_vm14, %v920_v14, %v922_v32  ;;  %v928_v38 = vsel %vm925_vm14, %v922_v32, %v924_v29  ;;  %v1121_v49 = vpop.permute.xlu2 %1120  ;;  %vm1841_vm12 = vcmask 785408  }
  0xc6   : > { %v826_v39 = vsel %vm2501_vm2, %v820_v33, 0.0  ;;  %2124 = vmatpush.msk.msrb.mxu1 %vm520_vm3, %v927_v37  ;;  %2126 = vmatpush.msk.msrb.mxu2 %vm520_vm3, %v928_v38 }
  0xc7   : > { %2119 = vmatpush.msk.msra.mxu3 %vm520_vm3, %v826_v39  ;;  %2125 = vmatmul.msk.f32.vlgmr.msrb.gmra.mxu1 %vm516_vm4, %v2121_v30 }
  0xc8   : > { %2120 = vmatmul.msk.f32.vlgmr.msra.gmra.mxu3 %vm516_vm4, %v2114_v21  ;;  %2127 = vmatmul.msk.f32.vlgmr.msrb.gmra.mxu2 %vm516_vm4, %v2121_v30 }
  0xcc   : > { %v1017_v41 = vpop.permute.xlu1 %1016  ;;  %v1015_v42 = vpop.permute.xlu0 %1014 }
  0xcd   : > { %v1022_v43 = vsel %vm1020_vm15, %v1015_v42, %v1017_v41  ;;  %v1021_v44 = vsel %vm1020_vm15, %v1013_v40, %v1015_v42 }
  0xce   : > { %v1028_v47 = vsel %vm2541_vm11, %v1022_v43, 0.0  ;;  %v1027_v48 = vsel %vm2537_vm10, %v1021_v44, 0.0 }
  0xcf   : > { %2129 = vmatpush.msk.msrb.mxu3 %vm520_vm3, %v1027_v48  ;;  %2131 = vmatpush.msk.msra.mxu0 %vm520_vm3, %v1028_v47 }
  0xd0   : > { %2130 = vmatmul.msk.f32.vlgmr.msrb.gmra.mxu3 %vm516_vm4, %v2128_v45  ;;  %2132 = vmatmul.msk.f32.vlgmr.msra.gmra.mxu0 %vm516_vm4, %v2128_v45 }
  0xd4   : > { %v1019_v50 = vpop.permute.xlu0 %1018  ;;  %v1119_v51 = vpop.permute.xlu1 %1118 }
  0xd5   : > { %v1023_v52 = vsel %vm1020_vm15, %v1017_v41, %v1019_v50  ;;  %v1127_v53 = vsel %vm1126_vm0, %v1119_v51, %v1121_v49 }
  0xd6   : > { %v1029_v57 = vsel %vm2560_vm13, %v1023_v52, 0.0  ;;  %v1133_v58 = vsel %vm2512_vm7, %v1127_v53, 0.0 }
  0xd7   : > { %2133 = vmatpush.msk.msra.mxu1 %vm520_vm3, %v1029_v57  ;;  %2136 = vmatpush.msk.msra.mxu2 %vm520_vm3, %v1133_v58 }
  0xd8   : > { %2134 = vmatmul.msk.f32.vlgmr.msra.gmra.mxu1 %vm516_vm4, %v2128_v45  ;;  %2137 = vmatmul.msk.f32.vlgmr.msra.gmra.mxu2 %vm516_vm4, %v2135_v54 }
  0xd9   : > { %2143 = vmatpush.msk.msrb.mxu1 %vm520_vm3, %v2487_v34  ;;  %2145 = vmatpush.msk.msrb.mxu2 %vm520_vm3, %v2489_v35  ;;  %v1308_v34 = vpop.permute.xlu2 %1307 }
  0xdc   : > { %v1123_v59 = vpop.permute.xlu0 %1122  ;;  %v1125_v60 = vpop.permute.xlu1 %1124 }
  0xdd   : > { %v1128_v61 = vsel %vm1126_vm0, %v1121_v49, %v1123_v59  ;;  %v1129_v62 = vsel %vm1126_vm0, %v1123_v59, %v1125_v60 }
  0xde   : > { %v1134_v63 = vsel %vm2516_vm8, %v1128_v61, 0.0  ;;  %v1135_v1 = vsel %vm2501_vm2, %v1129_v62, 0.0  ;;  %vm1410_vm2 = vcmask 261248  }
  0xdf   : > { %2138 = vmatpush.msk.msra.mxu3 %vm520_vm3, %v1134_v63  ;;  %2140 = vmatpush.msk.msrb.mxu0 %vm520_vm3, %v1135_v1 }
  0xe0   : > { %2139 = vmatmul.msk.f32.vlgmr.msra.gmra.mxu3 %vm516_vm4, %v2135_v54  ;;  %2141 = vmatmul.msk.f32.vlgmr.msrb.gmra.mxu0 %vm516_vm4, %v2135_v54 }
  0xe1   : > { %2144 = vmatmul.msk.f32.vlgmr.msrb.gmra.mxu1 %vm516_vm4, %v2142_v2  ;;  %2146 = vmatmul.msk.f32.vlgmr.msrb.gmra.mxu2 %vm516_vm4, %v2142_v2  ;;  %v482_v20 = vpop.permute.xlu2 %481 }
  0xe2   : > { %2147 = vmatpush.msk.msrb.mxu3 %vm520_vm3, %v2493_v36 }
  0xe4   : > { %v1310_v35 = vpop.permute.xlu0 %1309  ;;  %v1312_v46 = vpop.permute.xlu1 %1311 }
  0xe5   : > { %v1314_v3 = vsel %vm1313_vm1, %v1308_v34, %v1310_v35  ;;  %v1315_v6 = vsel %vm1313_vm1, %v1310_v35, %v1312_v46  ;;  %v1321_v7 = vsel %vm2560_vm13, %v1312_v46, 0.0 }
  0xe6   : > { %v1319_v9 = vsel %vm2537_vm10, %v1314_v3, 0.0  ;;  %v1320_v10 = vsel %vm2541_vm11, %v1315_v6, 0.0  ;;  %2154 = vmatpush.msk.msra.mxu2 %vm520_vm3, %v1321_v7 }
  0xe7   : > { %2150 = vmatpush.msk.msra.mxu0 %vm520_vm3, %v1319_v9  ;;  %2152 = vmatpush.msk.msra.mxu1 %vm520_vm3, %v1320_v10  ;;  %vm1437_vm3 = vcmask 64512  }
  0xe8   : > { %2148 = vmatmul.msk.f32.vlgmr.msrb.gmra.mxu3 %vm516_vm4, %v2142_v2  ;;  %2151 = vmatmul.msk.f32.vlgmr.msra.gmra.mxu0 %vm516_vm4, %v2149_v8 }
  0xe9   : > { %2153 = vmatmul.msk.f32.vlgmr.msra.gmra.mxu1 %vm516_vm4, %v2149_v8  ;;  %2155 = vmatmul.msk.f32.vlgmr.msra.gmra.mxu2 %vm516_vm4, %v2149_v8  ;;  %vm1663_vm4 = vcmask 916480  }
 0x121   : > { %v587_v12 = vpop.f32.mrf.mxu2 }
 0x122   : > { %v592_v37 = vadd.f32 %v587_v12, %v482_v20 }
 0x125   : > { %v547_v36 = vpop.f32.mrf.mxu0  ;;  %v567_v11 = vpop.f32.mrf.mxu1 }
 0x126   : > { %v590_v22 = vadd.f32 %v547_v36, %v482_v20  ;;  %v591_v28 = vadd.f32 %v567_v11, %v482_v20 }
 0x12d   : > { %v660_v13 = vpop.f32.mrf.mxu0  ;;  %v640_v15 = vpop.f32.mrf.mxu3 }
 0x12e   : > { %v680_v14 = vpop.f32.mrf.mxu1  ;;  %v683_v26 = vadd.f32 %v640_v15, %v590_v22  ;;  %v684_v33 = vadd.f32 %v660_v13, %v591_v28  ;;  %v2160_v15 = vld [vmem:[%s2813_s5 + $0x8] sm:$0xff] }
 0x12f   : > { %v685_v41 = vadd.f32 %v680_v14, %v592_v37 }
 0x133   : > { %v752_v16 = vpop.f32.mrf.mxu2 }
 0x134   : > { %v795_v29 = vadd.f32 %v752_v16, %v683_v26  ;;  %v1425_v16 = vpop.permute.xlu0 %1424  ;;  %v1436_v26 = vld [vmem:[%s2813_s5] sm:$0xff] }
 0x135   : > { %v792_v17 = vpop.f32.mrf.mxu0  ;;  %v772_v21 = vpop.f32.mrf.mxu3 }
 0x136   : > { %v858_v18 = vpop.f32.mrf.mxu1  ;;  %v796_v39 = vadd.f32 %v772_v21, %v684_v33  ;;  %v797_v49 = vadd.f32 %v792_v17, %v685_v41  ;;  %v1412_v21 = vld [vmem:[%s2814_s6] sm:$0xff] }
 0x137   : > { %v901_v38 = vadd.f32 %v858_v18, %v795_v29 }
 0x13d   : > { %v955_v24 = vpop.f32.mrf.mxu0 }
 0x13e   : > { %v998_v43 = vadd.f32 %v955_v24, %v901_v38  ;;  %v2163_v38 = vld [vmem:[%s2813_s5 + $0x10] sm:$0xff] }
 0x143   : > { %v878_v23 = vpop.f32.mrf.mxu2 }
 0x144   : > { %v975_v25 = vpop.f32.mrf.mxu1  ;;  %v902_v42 = vadd.f32 %v878_v23, %v796_v39  ;;  %v2168_v39 = vld [vmem:[%s2813_s5 + $0x18] sm:$0xff] }
 0x146   : > { %v999_v50 = vadd.f32 %v975_v25, %v902_v42 }
 0x14b   : > { %v898_v27 = vpop.f32.mrf.mxu3  ;;  %v995_v30 = vpop.f32.mrf.mxu2 }
 0x14c   : > { %v903_v52 = vadd.f32 %v898_v27, %v797_v49 }
 0x14d   : > { %v1081_v31 = vpop.f32.mrf.mxu0 }
 0x14e   : > { %v1105_v53 = vadd.f32 %v1081_v31, %v999_v50  ;;  %v1000_v61 = vadd.f32 %v995_v30, %v903_v52  ;;  %v2173_v50 = vld [vmem:[%s2813_s5 + $0x20] sm:$0xff] }
 0x153   : > { %v1061_v40 = vpop.f32.mrf.mxu3 }
 0x154   : > { %v1104_v47 = vadd.f32 %v1061_v40, %v998_v43 }
 0x155   : > { %v1101_v32 = vpop.f32.mrf.mxu1 }
 0x156   : > { %v1106_v2 = vadd.f32 %v1101_v32, %v1000_v61 }
 0x15b   : > { %v1167_v44 = vpop.f32.mrf.mxu2 }
 0x15c   : > { %v1210_v51 = vadd.f32 %v1167_v44, %v1104_v47 }
 0x15d   : > { %v1207_v45 = vpop.f32.mrf.mxu0 }
 0x15e   : > { %v1251_v48 = vpop.f32.mrf.mxu1  ;;  %v1212_v46 = vadd.f32 %v1207_v45, %v1106_v2 }
 0x15f   : > { %v1294_v57 = vadd.f32 %v1251_v48, %v1210_v51 }
 0x163   : > { %v1187_v54 = vpop.f32.mrf.mxu3 }
 0x164   : > { %v1211_v58 = vadd.f32 %v1187_v54, %v1105_v53  ;;  %v1271_v59 = vpop.f32.mrf.mxu2 }
 0x165   : > { %v1353_v60 = vpop.f32.mrf.mxu0 }
 0x166   : > { %v1295_v62 = vadd.f32 %v1271_v59, %v1211_v58  ;;  %v1396_v63 = vadd.f32 %v1353_v60, %v1294_v57  ;;  %v1373_v1 = vpop.f32.mrf.mxu1  ;;  %v2181_v59 = vld [vmem:[%s2813_s5 + $0x30] sm:$0xff]  ;;  %v2186_v60 = vld [vmem:[%s2813_s5 + $0x38] sm:$0xff] }
 0x168   : > { %v1399_v34 = vmax.f32 %v1396_v63, 0.0  ;;  %v1397_v35 = vadd.f32 %v1373_v1, %v1295_v62 }
 0x16a   : > { %1402 = vst [vmem:[#allocation3 + $0x8] sm:$0xff] %v1399_v34  ;;  %v1400_v3 = vmax.f32 %v1397_v35, 0.0  ;;  %v2189_v35 = vld [vmem:[%s2813_s5 + $0x40] sm:$0xff] }
 0x16b   : > { %1409 = vst.msk [vmem:[#allocation3 + $0x8] sm:$0xff] %vm925_vm14, %v2365_v0  ;;  %v1291_v6 = vpop.f32.mrf.mxu3 }
 0x16c   : > { %v1296_v7 = vadd.f32 %v1291_v6, %v1212_v46  ;;  %v1393_v8 = vpop.f32.mrf.mxu2  ;;  %1597 = vrot.lane.b32.xlu0 %v1400_v3, %s2375_s18  ;;  %1538 = vrot.lane.b32.xlu1 %v1400_v3, %s2373_s29 }
 0x16d   : > { %1428 = vrot.lane.b32.xlu2 %v1400_v3, %s2372_s28  ;;  %1523 = vmatpush.msrb.mxu2 %v1400_v3 }
 0x16e   : > { %v1398_v9 = vadd.f32 %v1393_v8, %v1296_v7  ;;  %2162 = vmatmul.msk.f32.vlgmr.msrb.gmra.mxu2 %vm1437_vm3, %v2160_v15 }
 0x170   : > { %v1401_v10 = vmax.f32 %v1398_v9, 0.0 }
 0x172   : > { %1404 = vst.msk [vmem:[#allocation3 + $0x18] sm:$0xff] %vm611_vm6, %v1401_v10  ;;  %v1530_v36 = vld [vmem:[#allocation3 + $0x8] sm:$0xff]  ;;  %vm1779_vm6 = vcmask 793600  }
 0x173   : > { %1411 = vst.msk [vmem:[#allocation3 + $0x18] sm:$0xff] %vm1410_vm2, %v2365_v0  ;;  %1503 = vmatpush.msrb.mxu1 %v1530_v36  ;;  %v2273_v11 = vpack.i.bf16 %v1400_v3, %v1530_v36 }
 0x174   : > { %1536 = vrot.lane.b32.xlu0 %v1530_v36, %s2373_s29  ;;  %1426 = vrot.lane.b32.xlu1 %v1530_v36, %s2372_s28  ;;  %s2380_s28 = smov 96  }
 0x175   : > { %1715 = vrot.lane.b32.xlu2 %v1400_v3, %s2376_s19  ;;  %2161 = vmatmul.msk.f32.vlgmr.msrb.gmra.mxu1 %vm1437_vm3, %v2160_v15 }
 0x17a   : > { %v1532_v12 = vld [vmem:[#allocation3 + $0x18] sm:$0xff] }
 0x17b   : > { %v2278_v0 = vpack.i.bf16 %v1532_v12, %v1400_v3 }
 0x17c   : > { %1595 = vrot.lane.b32.xlu0 %v1530_v36, %s2375_s18  ;;  %1773 = vrot.lane.b32.xlu1 %v1530_v36, %s2377_s20 }
 0x17d   : > { %2274 = vrot.lane.b32.xlu2 %v2273_v11, %s2378_s21 }
 0x184   : > { %1713 = vrot.lane.b32.xlu0 %v1530_v36, %s2376_s19  ;;  %1599 = vrot.lane.b32.xlu1 %v1532_v12, %s2375_s18 }
 0x185   : > { %1540 = vrot.lane.b32.xlu2 %v1532_v12, %s2373_s29 }
 0x18c   : > { %1717 = vrot.lane.b32.xlu0 %v1532_v12, %s2376_s19  ;;  %1661 = vrot.lane.b32.xlu1 %v1532_v12, %s2378_s21  ;;  %s1969_s19 = scalar_lea.hbm %s2815_s7, %s2200_s16 }
 0x18d   : > { %1775 = vrot.lane.b32.xlu2 %v1400_v3, %s2377_s20 }
 0x194   : > { %1891 = vrot.lane.b32.xlu0 %v1530_v36, %s2379_s22  ;;  %1777 = vrot.lane.b32.xlu1 %v1532_v12, %s2377_s20  ;;  %s382_s20 = scalar_lea.vmem [#allocation4], %s2091_s15 }
 0x195   : > { %2279 = vrot.lane.b32.xlu2 %v2278_v0, %s2380_s28  ;;  %s1971_s21 = sshll.u32 %s382_s20, 4  ;;  %s1972_s21 = int_to_ptr.vmem [resolvable:$true] %s1971_s21 }
 0x19c   : > { %1895 = vrot.lane.b32.xlu0 %v1532_v12, %s2379_s22  ;;  %1893 = vrot.lane.b32.xlu1 %v1400_v3, %s2379_s22  ;;  %s1973_s22 = sshll.u32 %s1969_s19, 4  ;;  %s1974_s22 = int_to_ptr.hbm [resolvable:$true] %s1973_s22 }
 0x19d   : > { %1835 = vrot.lane.b32.xlu2 %v1530_v36, %s2380_s28  ;;  %s2299_s28 = sshra.s32 %s1974_s22, 4  ;;  %s2300_s28 = int_to_ptr.hbm [resolvable:$true] %s2299_s28 }
 0x19e   : > { %s2301_s23 = scalar_lea.hbm %s2300_s28, 16  ;;  %p2306_p1 = scmp.lt.s32.totalorder %s2300_s28, %s2815_s7 }
 0x19f   : > { %p2302_p12 = scmp.ne.s32.totalorder %s2300_s28, %s2301_s23  ;;  %p2307_p2 = scmp.lt.s32.totalorder %s2305_s10, %s2301_s23 }
 0x1a1   : > { %p2303_p13 = pnand %p2302_p12, %p2461_p4  ;;  %p2308_p3 = por %p2307_p2, %p2306_p1 }
 0x1a3   : > { %p2304_p0 = pneg %p2303_p13 }
 0x1a4   : > { %1415 = vperm.xlu1 %2283, %v1412_v21  }
 0x1a5   : > { %p2309_p5 = pnand %p2308_p3, %p2304_p0 }
 0x1c7   : > { %v1429_v13 = vpop.permute.xlu2 %1428 }
 0x1cf   : > { %v2677_v14 = vpop.permute.xlu2 %1715 }
 0x1d7   : > { %v2275_v17 = vpop.permute.xlu2 %2274 }
 0x1d8   : > { %v2277_v22 = vunpack.i.h.bf16 %v2275_v17  ;;  %v2276_v23 = vunpack.i.l.bf16 %v2275_v17 }
 0x1da   : > { %v1664_v32 = vsel %vm1663_vm4, %v2276_v23, %v2277_v22 }
 0x1de   : > { %v1598_v18 = vpop.permute.xlu0 %1597  ;;  %v1539_v19 = vpop.permute.xlu1 %1538 }
 0x1df   : > { %v1541_v20 = vpop.permute.xlu2 %1540 }
 0x1e0   : > { %v1543_v31 = vsel %vm1313_vm1, %v1539_v19, %v1541_v20 }
 0x1e6   : > { %v1537_v24 = vpop.permute.xlu0 %1536  ;;  %v1427_v25 = vpop.permute.xlu1 %1426 }
 0x1e7   : > { %v2690_v27 = vpop.permute.xlu2 %1775  ;;  %v1542_v28 = vsel %vm1313_vm1, %v1537_v24, %v1539_v19  ;;  %v1430_v29 = vsel %vm1126_vm0, %v1425_v16, %v1427_v25  ;;  %v1431_v30 = vsel %vm1126_vm0, %v1427_v25, %v1429_v13 }
 0x1e8   : > { %2156 = vmatpush.msk.msra.mxu3 %vm2512_vm7, %v1430_v29  ;;  %2158 = vmatpush.msk.msrb.mxu0 %vm2516_vm8, %v1431_v30 }
 0x1e9   : > { %2157 = vmatmul.msk.f32.vlgmr.msra.gmra.mxu3 %vm1437_vm3, %v1436_v26  ;;  %2159 = vmatmul.msk.f32.vlgmr.msrb.gmra.mxu0 %vm1437_vm3, %v1436_v26 }
 0x1ea   : > { %2166 = vmatpush.msk.msra.mxu0 %vm2541_vm11, %v1543_v31  ;;  %2164 = vmatpush.msk.msrb.mxu3 %vm2537_vm10, %v1542_v28 }
 0x1ec   : > { %1686 = vmatpush.msra.mxu3 %v1664_v32 }
 0x1ee   : > { %v1596_v33 = vpop.permute.xlu0 %1595  ;;  %v1774_v37 = vpop.permute.xlu1 %1773 }
 0x1ef   : > { %v2280_v40 = vpop.permute.xlu2 %2279  ;;  %v1602_v41 = vsel %vm1601_vm5, %v1596_v33, %v1598_v18  ;;  %v1780_v42 = vsel %vm1779_vm6, %v1774_v37, %v2690_v27 }
 0x1f0   : > { %2169 = vmatpush.msk.msra.mxu1 %vm2512_vm7, %v1602_v41  ;;  %v2281_v43 = vunpack.i.l.bf16 %v2280_v40  ;;  %v2282_v52 = vunpack.i.h.bf16 %v2280_v40 }
 0x1f1   : > { %2165 = vmatmul.msk.f32.vlgmr.msrb.gmra.mxu3 %vm1437_vm3, %v2163_v38  ;;  %2170 = vmatmul.msk.f32.vlgmr.msra.gmra.mxu1 %vm1437_vm3, %v2168_v39  ;;  %v1525_v8 = vpop.f32.mrf.mxu2 }
 0x1f2   : > { %2182 = vmatpush.msk.msrb.mxu3 %vm2512_vm7, %v1780_v42  ;;  %2167 = vmatmul.msk.f32.vlgmr.msra.gmra.mxu0 %vm1437_vm3, %v2163_v38  ;;  %v1843_v61 = vsel %vm1841_vm12, %v2281_v43, %v2282_v52  ;;  %vm1897_vm7 = vcmask 777216   ;;  %v1505_v7 = vpop.f32.mrf.mxu1 }
 0x1f6   : > { %v1714_v44 = vpop.permute.xlu0 %1713  ;;  %v1600_v45 = vpop.permute.xlu1 %1599 }
 0x1f7   : > { %v1836_v47 = vpop.permute.xlu2 %1835  ;;  %v1720_v48 = vsel %vm1719_vm9, %v1714_v44, %v2677_v14  ;;  %v1603_v49 = vsel %vm1601_vm5, %v1598_v18, %v1600_v45 }
 0x1f8   : > { %v1842_v51 = vsel %vm1841_vm12, %v1836_v47, %v2281_v43  ;;  %2171 = vmatpush.msk.msra.mxu2 %vm2516_vm8, %v1603_v49  ;;  %2177 = vmatpush.msk.msrb.mxu1 %vm2537_vm10, %v1720_v48 }
 0x1f9   : > { %2172 = vmatmul.msk.f32.vlgmr.msra.gmra.mxu2 %vm1437_vm3, %v2168_v39  ;;  %2174 = vmatmul.msk.f32.vlgmr.msra.gmra.mxu3 %vm1437_vm3, %v2173_v50 }
 0x1fa   : > { %1864 = vmatpush.msra.mxu1 %v1842_v51 }
 0x1fb   : > { %2178 = vmatmul.msk.f32.vlgmr.msrb.gmra.mxu1 %vm1437_vm3, %v2176_v55 }
 0x1fe   : > { %v1718_v53 = vpop.permute.xlu0 %1717  ;;  %v1662_v54 = vpop.permute.xlu1 %1661 }
 0x1ff   : > { %v1721_v57 = vsel %vm1719_vm9, %v2677_v14, %v1718_v53  ;;  %v1665_v58 = vsel %vm1663_vm4, %v2277_v22, %v1662_v54 }
 0x200   : > { %1706 = vmatpush.msrb.mxu0 %v1665_v58  ;;  %2179 = vmatpush.msk.msrb.mxu2 %vm2541_vm11, %v1721_v57 }
 0x201   : > { %2175 = vmatmul.msk.f32.vlgmr.msrb.gmra.mxu0 %vm1437_vm3, %v2173_v50  ;;  %2180 = vmatmul.msk.f32.vlgmr.msrb.gmra.mxu2 %vm1437_vm3, %v2176_v55 }
 0x202   : > { %1884 = vmatpush.msra.mxu2 %v1843_v61  ;;  %2183 = vmatmul.msk.f32.vlgmr.msrb.gmra.mxu3 %vm1437_vm3, %v2181_v59 }
 0x203   : > { %2187 = vmatmul.msk.f32.vlgmr.msra.gmra.mxu1 %vm1437_vm3, %v2186_v60 }
 0x206   : > { %v1892_v62 = vpop.permute.xlu0 %1891  ;;  %v1778_v63 = vpop.permute.xlu1 %1777 }
 0x207   : > { %v1781_v1 = vsel %vm1779_vm6, %v2690_v27, %v1778_v63 }
 0x208   : > { %2184 = vmatpush.msk.msra.mxu0 %vm2516_vm8, %v1781_v1 }
 0x209   : > { %2185 = vmatmul.msk.f32.vlgmr.msra.gmra.mxu0 %vm1437_vm3, %v2181_v59  ;;  %2188 = vmatmul.msk.f32.vlgmr.msra.gmra.mxu2 %vm1437_vm3, %v2186_v60 }
 0x20e   : > { %v1896_v2 = vpop.permute.xlu0 %1895  ;;  %v1894_v34 = vpop.permute.xlu1 %1893 }
 0x20f   : > { %v1898_v46 = vsel %vm1897_vm7, %v1892_v62, %v1894_v34  ;;  %v1899_v3 = vsel %vm1897_vm7, %v1894_v34, %v1896_v2 }
 0x210   : > { %2190 = vmatpush.msk.msra.mxu3 %vm2537_vm10, %v1898_v46  ;;  %2192 = vmatpush.msk.msrb.mxu0 %vm2541_vm11, %v1899_v3 }
 0x211   : > { %2191 = vmatmul.msk.f32.vlgmr.msra.gmra.mxu3 %vm1437_vm3, %v2189_v35  ;;  %2193 = vmatmul.msk.f32.vlgmr.msrb.gmra.mxu0 %vm1437_vm3, %v2189_v35 }
 0x216   : > { %v1416_v10 = vpop.permute.xlu1 %1415 }
 0x266   : > { %v1478_v56 = vpop.f32.mrf.mxu0 }
 0x267   : > { %v1482_v36 = vadd.f32 %v1478_v56, %v1416_v10 }
 0x269   : > { %v1529_v0 = vadd.f32 %v1525_v8, %v1482_v36 }
 0x26c   : > { %v1458_v6 = vpop.f32.mrf.mxu3 }
 0x26d   : > { %v1481_v12 = vadd.f32 %v1458_v6, %v1416_v10 }
 0x26e   : > { %v1630_v4 = vpop.f32.mrf.mxu1 }
 0x26f   : > { %v1590_v9 = vpop.f32.mrf.mxu0  ;;  %v1528_v14 = vadd.f32 %v1505_v7, %v1481_v12 }
 0x270   : > { %v1594_v15 = vadd.f32 %v1590_v9, %v1529_v0 }
 0x274   : > { %v1570_v11 = vpop.f32.mrf.mxu3 }
 0x275   : > { %v1593_v17 = vadd.f32 %v1570_v11, %v1528_v14 }
 0x277   : > { %v1653_v21 = vadd.f32 %v1630_v4, %v1593_v17 }
 0x278   : > { %v1748_v22 = vpop.f32.mrf.mxu1 }
 0x27c   : > { %v1650_v13 = vpop.f32.mrf.mxu2  ;;  %v1688_v18 = vpop.f32.mrf.mxu3 }
 0x27d   : > { %v1654_v16 = vadd.f32 %v1650_v13, %v1594_v15  ;;  %v1711_v25 = vadd.f32 %v1688_v18, %v1653_v21 }
 0x27e   : > { %v1708_v5 = vpop.f32.mrf.mxu0 }
 0x27f   : > { %v1712_v20 = vadd.f32 %v1708_v5, %v1654_v16  ;;  %v1771_v29 = vadd.f32 %v1748_v22, %v1711_v25 }
 0x280   : > { %v1866_v37 = vpop.f32.mrf.mxu1 }
 0x284   : > { %v1768_v19 = vpop.f32.mrf.mxu2 }
 0x285   : > { %v1772_v24 = vadd.f32 %v1768_v19, %v1712_v20  ;;  %v1808_v27 = vpop.f32.mrf.mxu3 }
 0x286   : > { %v1828_v23 = vpop.f32.mrf.mxu0  ;;  %v1831_v32 = vadd.f32 %v1808_v27, %v1771_v29 }
 0x287   : > { %v1832_v26 = vadd.f32 %v1828_v23, %v1772_v24 }
 0x288   : > { %v1889_v39 = vadd.f32 %v1866_v37, %v1831_v32 }
 0x28c   : > { %v1886_v28 = vpop.f32.mrf.mxu2 }
 0x28d   : > { %v1890_v30 = vadd.f32 %v1886_v28, %v1832_v26 }
 0x28e   : > { %v1946_v31 = vpop.f32.mrf.mxu0 }
 0x28f   : > { %v1950_v33 = vadd.f32 %v1946_v31, %v1890_v30 }
 0x291   : > { %v1952_v38 = vmax.f32 %v1950_v33, 0.0 }
 0x293   : > { %1954 = vst [vmem:[%s382_s20 + $0x8] sm:$0xff] %v1952_v38 }
 0x294   : > { %v1926_v40 = vpop.f32.mrf.mxu3 }
 0x295   : > { %v1949_v41 = vadd.f32 %v1926_v40, %v1889_v39 }
 0x297   : > { %v1951_v42 = vmax.f32 %v1949_v41, 0.0 }
 0x299   : > { %1953 = vst [vmem:[%s382_s20] sm:$0xff] %v1951_v42 }
 0x29a   : > { %2312 = shalt.err (!%p2309_p5)
}
 0x29b   : > { %2201 = dma.vmem_to_hbm [thread:$0]  (%p2461_p4), %s1972_s21, 256, %s1974_s22, %s1956_s25  }
 0x29c PF: > { %p2207_p6 = scmp.ge.s32.totalorder %s2363_s27, 2  ;;  %s1985_s14 = sand.u32 1, %s2343_s1  }
 0x29d   : > { %s1986_s16 = scalar_lea.sflag [#allocation5], %s1985_s14 }
 0x29e   : > { %p2204_p7 = pnand %p2207_p6, %p2468_p8 }
 0x2a0   : > { %p2205_p9 = pneg %p2204_p7 }
 0x2a2   : > { %2338 = dma.done.wait (%p2205_p9), %s1986_s16, 256  }
 0x2a3   : > { %2340 = vsyncadd (%p2205_p9), %s1986_s16, 4294967040  ;;  %s20_s27 = sadd.s32 1, %s2363_s27   ;;  %s2830_s1 = smov %s2347_s2 }
 0x2a4   : > { %p17_p10 = scmp.ge.s32.totalorder %s20_s27, 4   ;;  %s2831_s2 = smov %s2351_s24 }
 0x2a5   : > { %s2832_s24 = smov %s2474_s12  ;;  %s2833_s25 = smov %s2359_s26 }
 0x2a6   : > { %s2834_s26 = smov %s2836_s30  ;;  %19 = sbr.rel (!%p17_p10) target bundleno = 4 (0x4), region = 118 }
 0x2ab   :  { %1992 = vsyncpa [#allocation5], 1 }
 0x2ac   :  { %1994 = vsyncpa [#allocation5 + $0x1], 1 }

</bundles_post_ra>
